<compile_context>
chip_gen: v5e
topology: v5e:2x2
jax: 0.10.0
libtpu: 0.0.40
codegen_flags: <defaults>
</compile_context>

<pallas_src>
import math

import jax
import jax.numpy as jnp
from jax import lax
from jax.experimental import pallas as pl
from jax.experimental.pallas import tpu as pltpu

# ----------------------------- configuration -------------------------------
B_SZ    = 2                      # batch
L_SEQ   = 16                     # sequence length
D_MODEL = 32
EXPAND  = 2
D_INNER = EXPAND * D_MODEL       # 64
D_STATE = 16
D_CONV  = 4
DT_RANK = math.ceil(D_MODEL / 16)          # 2
EPS     = 1e-5                   # RMSNorm eps

N_TOK = B_SZ * L_SEQ             # 32 tokens
BDI   = B_SZ * D_INNER           # 128 = lane-dense channel axis (batch in lanes)
_DBC  = DT_RANK + 2 * D_STATE    # 34

# row layout of the packed (23, BDI) parameter block (per-channel params tiled
# across the batch lane groups)
_ROW_A     = 0                            # [0, 16)  : A^T = (-exp(A_log))^T
_ROW_CONVW = _ROW_A + D_STATE             # [16, 20) : depthwise conv taps
_ROW_CONVB = _ROW_CONVW + D_CONV          # 20       : conv bias
_ROW_DTB   = _ROW_CONVB + 1               # 21       : dt_proj bias
_ROW_D     = _ROW_DTB + 1                 # 22       : D
_PACK_ROWS = _ROW_D + 1                   # 23


def _silu(v):
    # silu(v) = v * sigmoid(v); sigmoid(v) = 0.5*(1 + tanh(v/2)) -> one EUP op.
    return v * (0.5 * jnp.tanh(0.5 * v) + 0.5)


def _tok_to_ld(v_tok):
    # (B*L, C) token rows (b, t)  ->  (L, B*C) lane-dense (batch folded into lanes)
    c = v_tok.shape[-1]
    v3 = v_tok.reshape(B_SZ, L_SEQ, c)
    return jnp.concatenate([v3[b] for b in range(B_SZ)], axis=-1)


def _ld_to_tok(v_ld):
    # (L, B*C) lane-dense  ->  (B*L, C) token rows (b, t)
    c = v_ld.shape[-1] // B_SZ
    return jnp.concatenate([v_ld[:, b * c:(b + 1) * c] for b in range(B_SZ)],
                           axis=0)


# ------------------------------- kernel ------------------------------------
def mamba_residual_kernel(x_ref, w_in_ref, pack_ref, w_dtc_ref, w_bc_ref,
                          w_out_ref, o_ref, da_scr, bx_scr, hs_scr):
    f32 = jnp.float32
    x_tok = x_ref[...]                                      # (32, 32) rows (b, t)

    # ---- RMSNorm (gamma folded into in_proj weight in the wrapper) ---------
    ms = jnp.mean(x_tok * x_tok, axis=-1, keepdims=True)
    xn = x_tok * lax.rsqrt(ms + EPS)

    # ---- in_proj: one 128-lane-wide MXU matmul producing [x | z] -----------
    xz = jnp.dot(xn, w_in_ref[...], preferred_element_type=f32)      # (32, 128)
    xin_ld = _tok_to_ld(xz[:, :D_INNER])                    # (16, 128) = (L, B*DI)
    z_tok  = xz[:, D_INNER:]                                # (32, 64)

    # ---- depthwise causal conv1d + SiLU (lane-dense); shifts on the XLU ----
    conv_b = pack_ref[_ROW_CONVB:_ROW_CONVB + 1, :]
    acc = pack_ref[_ROW_CONVW + D_CONV - 1:_ROW_CONVW + D_CONV, :] * xin_ld + conv_b
    tok_iota = lax.broadcasted_iota(jnp.int32, (L_SEQ, BDI), 0)
    for k in range(D_CONV - 1):                     # taps with non-zero delay
        delay = D_CONV - 1 - k
        shifted = pltpu.roll(xin_ld, delay, axis=0)         # row t <- row t-delay
        shifted = jnp.where(tok_iota < delay, 0.0, shifted)  # causal zero-fill
        acc = acc + pack_ref[_ROW_CONVW + k:_ROW_CONVW + k + 1, :] * shifted
    xs_ld = _silu(acc)                                      # (16, 128)
    xs_f  = _ld_to_tok(xs_ld)                               # (32, 64) for the MXU

    # ---- x_proj (B|C) and dt_proj composed into x_proj: two clean matmuls --
    bc_tok   = jnp.dot(xs_f, w_bc_ref[...], preferred_element_type=f32)   # (32, 32)
    dlin_tok = jnp.dot(xs_f, w_dtc_ref[...], preferred_element_type=f32)  # (32, 64)

    # ---- delta = softplus(dt-linear + bias), lane-dense ---------------------
    dlin = _tok_to_ld(dlin_tok) + pack_ref[_ROW_DTB:_ROW_DTB + 1, :]      # (16, 128)
    delta_ld = jnp.maximum(dlin, 0.0) + jnp.log(1.0 + jnp.exp(-jnp.abs(dlin)))

    # ---- batched scan coefficients, hoisted out of the serial loop ----------
    a_bd = pack_ref[_ROW_A:_ROW_A + D_STATE, :]             # (16, 128) A^T tiled
    da_scr[...] = jnp.exp(delta_ld[:, None, :] * a_bd[None, :, :])   # (L, NS, B*DI)

    bc3 = bc_tok.reshape(B_SZ, L_SEQ, 2 * D_STATE)          # (B, L, 2*NS)

    def expand_bc(col0):
        # per-(b, t, n) value broadcast over the 64 channel lanes -> (L, NS, B*DI)
        parts = [jnp.broadcast_to(bc3[b, :, col0:col0 + D_STATE][:, :, None],
                                  (L_SEQ, D_STATE, D_INNER))
                 for b in range(B_SZ)]
        return jnp.concatenate(parts, axis=-1)

    bx_scr[...] = (delta_ld * xs_ld)[:, None, :] * expand_bc(0)      # delta*x*B

    # ---- selective scan: serial chain is just h = dA*h + bx (2 vregs/step) --
    h = jnp.zeros((D_STATE, BDI), f32)
    for t in range(L_SEQ):
        h = da_scr[t] * h + bx_scr[t]
        hs_scr[t] = h                                       # stream state to scratch

    # ---- batched readout: y = sum_n hs * C  +  D * xs -----------------------
    y_ld = jnp.sum(hs_scr[...] * expand_bc(D_STATE), axis=1)         # (16, 128)
    y_ld = y_ld + pack_ref[_ROW_D:_ROW_D + 1, :] * xs_ld

    # ---- gate with SiLU(z), out_proj (MXU), residual ------------------------
    out_tok = _ld_to_tok(y_ld) * _silu(z_tok)                        # (32, 64)
    o_ref[...] = x_tok + jnp.dot(out_tok, w_out_ref[...],
                                 preferred_element_type=f32)          # (32, 32)


# ------------------------------- wrapper ------------------------------------
def residual_block_pallas(x, params):
    (w_norm, w_in, conv_w, conv_b, w_xproj, w_dt, b_dt,
     a_log, d_param, w_out) = params
    f32 = jnp.float32

    # Fold RMSNorm gamma into in_proj:  ((x_hat * g) @ Win^T) == x_hat @ (Win*g)^T
    w_in_s = (w_in * w_norm[None, :]).T.astype(f32)                  # (Dm, 2*DI)
    # Compose dt_proj with the dt-rank rows of x_proj -> one (DI, DI) matmul.
    w_dtc = (w_dt @ w_xproj[:DT_RANK, :]).T.astype(f32)              # (DI, DI)
    w_bc = w_xproj[DT_RANK:, :].T.astype(f32)                        # (DI, 2*NS)
    w_out_t = w_out.T.astype(f32)                                    # (DI, Dm)

    def tile_b(v):                      # (DI,) -> (1, B*DI) tiled over batch lanes
        return jnp.tile(v[None, :], (1, B_SZ))

    pack = jnp.concatenate([
        jnp.tile((-jnp.exp(a_log)).T, (1, B_SZ)),     # (NS, B*DI)  A^T
        jnp.tile(conv_w[:, 0, :].T, (1, B_SZ)),       # (K,  B*DI)  depthwise taps
        tile_b(conv_b),                               # conv bias
        tile_b(b_dt),                                 # dt_proj bias
        tile_b(d_param),                              # D
    ], axis=0).astype(f32)                                           # (23, B*DI)

    # Token rows in natural (b, t) order: pure reshape, no host-side transpose.
    x_tok = x.astype(f32).reshape(N_TOK, D_MODEL)

    def full(shape):
        return pl.BlockSpec(shape, lambda i: (0,) * len(shape))

    out = pl.pallas_call(
        mamba_residual_kernel,
        out_shape=jax.ShapeDtypeStruct((N_TOK, D_MODEL), f32),
        grid_spec=pltpu.PrefetchScalarGridSpec(
            num_scalar_prefetch=0,
            grid=(1,),                         # whole problem in one grid step
            in_specs=[
                full((N_TOK, D_MODEL)),            # x (token rows)
                full((D_MODEL, 2 * D_INNER)),      # in_proj (norm-folded)
                full((_PACK_ROWS, BDI)),           # packed small params
                full((D_INNER, D_INNER)),          # dt_proj ∘ x_proj composed
                full((D_INNER, 2 * D_STATE)),      # x_proj -> [B | C]
                full((D_INNER, D_MODEL)),          # out_proj
            ],
            out_specs=full((N_TOK, D_MODEL)),
            scratch_shapes=[
                pltpu.VMEM((L_SEQ, D_STATE, BDI), jnp.float32),   # exp(delta*A)
                pltpu.VMEM((L_SEQ, D_STATE, BDI), jnp.float32),   # delta*x*B
                pltpu.VMEM((L_SEQ, D_STATE, BDI), jnp.float32),   # streamed states
            ],
        ),
        compiler_params=pltpu.CompilerParams(
            dimension_semantics=("arbitrary",)),
    )(x_tok, w_in_s, pack, w_dtc, w_bc, w_out_t)

    return out.reshape(B_SZ, L_SEQ, D_MODEL)


# --------------------------- parameter setup --------------------------------
def make_params(key):
    ks = jax.random.split(key, 9)
    w_norm = 1.0 + 0.1 * jax.random.normal(ks[0], (D_MODEL,), jnp.float32)
    w_in = jax.random.normal(ks[1], (2 * D_INNER, D_MODEL),
                             jnp.float32) / math.sqrt(D_MODEL)
    conv_w = jax.random.normal(ks[2], (D_INNER, 1, D_CONV),
                               jnp.float32) / math.sqrt(D_CONV)
    conv_b = 0.1 * jax.random.normal(ks[3], (D_INNER,), jnp.float32)
    w_xproj = jax.random.normal(ks[4], (_DBC, D_INNER),
                                jnp.float32) / math.sqrt(D_INNER)
    dt_std = DT_RANK ** -0.5
    w_dt = jax.random.uniform(ks[5], (D_INNER, DT_RANK), jnp.float32,
                              -dt_std, dt_std)
    dt = jnp.exp(jax.random.uniform(ks[6], (D_INNER,), jnp.float32)
                 * (math.log(0.1) - math.log(0.001)) + math.log(0.001))
    dt = jnp.maximum(dt, 1e-4)
    b_dt = dt + jnp.log(-jnp.expm1(-dt))                        # softplus^-1(dt)
    a_log = jnp.log(jnp.tile(jnp.arange(1, D_STATE + 1, dtype=jnp.float32),
                             (D_INNER, 1)))
    d_param = jnp.ones((D_INNER,), jnp.float32)
    w_out = jax.random.normal(ks[7], (D_MODEL, D_INNER),
                              jnp.float32) / math.sqrt(D_INNER)
    params = (w_norm, w_in, conv_w, conv_b, w_xproj, w_dt, b_dt,
              a_log, d_param, w_out)
    return params, ks[8]


# ------------------------- pure-JAX reference -------------------------------
def residual_block_ref(x, params):
    (w_norm, w_in, conv_w, conv_b, w_xproj, w_dt, b_dt,
     a_log, d_param, w_out) = params
    hp = lax.Precision.HIGHEST

    # RMSNorm
    ms = jnp.mean(x * x, axis=-1, keepdims=True)
    xn = x * lax.rsqrt(ms + EPS) * w_norm

    # in_proj
    xz = jnp.einsum('bld,ed->ble', xn, w_in, precision=hp)
    xin, z = xz[..., :D_INNER], xz[..., D_INNER:]

    # depthwise causal conv1d + chomp
    xt = jnp.transpose(xin, (0, 2, 1))                        # (B, DI, L)
    xt = jnp.pad(xt, ((0, 0), (0, 0), (D_CONV - 1, 0)))
    conv = conv_b[None, :, None]
    for k in range(D_CONV):
        conv = conv + conv_w[:, 0, k][None, :, None] * xt[:, :, k:k + L_SEQ]
    xs = jax.nn.silu(jnp.transpose(conv, (0, 2, 1)))          # (B, L, DI)

    # ssm
    a_mat = -jnp.exp(a_log)                                   # (DI, NS)
    dbc = jnp.einsum('bld,ed->ble', xs, w_xproj, precision=hp)
    delta_r = dbc[..., :DT_RANK]
    bm = dbc[..., DT_RANK:DT_RANK + D_STATE]
    cm = dbc[..., DT_RANK + D_STATE:]
    delta = jax.nn.softplus(
        jnp.einsum('blr,er->ble', delta_r, w_dt, precision=hp) + b_dt)
    delta_a = jnp.exp(delta[..., None] * a_mat)               # (B, L, DI, NS)
    bx = delta[..., None] * bm[:, :, None, :] * xs[..., None]

    def step(h, inp):
        da_t, bx_t = inp
        h = da_t * h + bx_t
        return h, h

    _, hs = lax.scan(step,
                     jnp.zeros((x.shape[0], D_INNER, D_STATE), jnp.float32),
                     (jnp.swapaxes(delta_a, 0, 1), jnp.swapaxes(bx, 0, 1)))
    hs = jnp.swapaxes(hs, 0, 1)                               # (B, L, DI, NS)
    y = jnp.einsum('bldn,bln->bld', hs, cm, precision=hp) + d_param * xs

    out = jnp.einsum('bld,ed->ble', y * jax.nn.silu(z), w_out, precision=hp)
    return out + x


# ---------------------------------- main -------------------------------------
if __name__ == "__main__":
    params, xkey = make_params(jax.random.PRNGKey(0))
    x = jax.random.normal(xkey, (B_SZ, L_SEQ, D_MODEL), jnp.float32)

    out = residual_block_pallas(x, params)
    out = jax.block_until_ready(out)

    ref = residual_block_ref(x, params)
    assert out.shape == (B_SZ, L_SEQ, D_MODEL)
    max_err = float(jnp.max(jnp.abs(out - ref)))
    assert jnp.allclose(out, ref, rtol=1e-3, atol=1e-3), max_err

    print("KERNEL_OK")
</pallas_src>

<mosaic_0001>
module attributes {stable_mosaic.version = 11 : i64} {
  func.func @mamba_residual_kernel(%arg0: i32, %arg1: memref<32x32xf32, #tpu.memory_space<vmem>>, %arg2: memref<32x128xf32, #tpu.memory_space<vmem>>, %arg3: memref<23x128xf32, #tpu.memory_space<vmem>>, %arg4: memref<64x64xf32, #tpu.memory_space<vmem>>, %arg5: memref<64x32xf32, #tpu.memory_space<vmem>>, %arg6: memref<64x32xf32, #tpu.memory_space<vmem>>, %arg7: memref<32x32xf32, #tpu.memory_space<vmem>>, %arg8: memref<16x16x128xf32, #tpu.memory_space<vmem>>, %arg9: memref<16x16x128xf32, #tpu.memory_space<vmem>>, %arg10: memref<16x16x128xf32, #tpu.memory_space<vmem>>) attributes {dimension_semantics = [#tpu.dimension_semantics<arbitrary>], iteration_bounds = array<i64: 1>, scalar_prefetch = 0 : i64, scratch_operands = 3 : i64, tpu.core_type = #tpu.core_type<tc>, window_params = [{pipeline_mode = #tpu.pipeline_mode<synchronous>, transform_indices = @transform_0, window_bounds = array<i64: 32, 32>}, {pipeline_mode = #tpu.pipeline_mode<synchronous>, transform_indices = @transform_1, window_bounds = array<i64: 32, 128>}, {pipeline_mode = #tpu.pipeline_mode<synchronous>, transform_indices = @transform_2, window_bounds = array<i64: 23, 128>}, {pipeline_mode = #tpu.pipeline_mode<synchronous>, transform_indices = @transform_3, window_bounds = array<i64: 64, 64>}, {pipeline_mode = #tpu.pipeline_mode<synchronous>, transform_indices = @transform_4, window_bounds = array<i64: 64, 32>}, {pipeline_mode = #tpu.pipeline_mode<synchronous>, transform_indices = @transform_5, window_bounds = array<i64: 64, 32>}, {pipeline_mode = #tpu.pipeline_mode<synchronous>, transform_indices = @transform_6, window_bounds = array<i64: 32, 32>}]} {
    %c0 = arith.constant 0 : index
    %c0_0 = arith.constant 0 : index
    %0 = vector.load %arg1[%c0, %c0_0] : memref<32x32xf32, #tpu.memory_space<vmem>>, vector<32x32xf32>
    %1 = arith.mulf %0, %0 : vector<32x32xf32>
    %cst = arith.constant dense<0.000000e+00> : vector<32xf32>
    %2 = vector.multi_reduction <add>, %1, %cst [1] : vector<32x32xf32> to vector<32xf32>
    %3 = vector.shape_cast %2 : vector<32xf32> to vector<32x1xf32>
    %cst_1 = arith.constant 3.200000e+01 : f32
    %4 = vector.broadcast %cst_1 : f32 to vector<32x1xf32>
    %5 = arith.divf %3, %4 : vector<32x1xf32>
    %cst_2 = arith.constant 9.99999974E-6 : f32
    %6 = vector.broadcast %cst_2 : f32 to vector<32x1xf32>
    %7 = arith.addf %5, %6 : vector<32x1xf32>
    %8 = math.rsqrt %7 : vector<32x1xf32>
    %9 = vector.broadcast %8 : vector<32x1xf32> to vector<32x32xf32>
    %10 = arith.mulf %0, %9 : vector<32x32xf32>
    %c0_3 = arith.constant 0 : index
    %c0_4 = arith.constant 0 : index
    %11 = vector.load %arg2[%c0_3, %c0_4] : memref<32x128xf32, #tpu.memory_space<vmem>>, vector<32x128xf32>
    %cst_5 = arith.constant dense<0.000000e+00> : vector<32x128xf32>
    %12 = tpu.matmul %10, %11, %cst_5 {dimension_numbers = #tpu.dot_dimension_numbers<[1], [0], [0], [1], [0, 0, 1, 1], [], []>} : vector<32x32xf32>, vector<32x128xf32>, vector<32x128xf32> -> vector<32x128xf32>
    %13 = vector.extract_strided_slice %12 {offsets = [0, 0], sizes = [32, 64], strides = [1, 1]} : vector<32x128xf32> to vector<32x64xf32>
    %14 = vector.shape_cast %13 : vector<32x64xf32> to vector<2x16x64xf32>
    %15 = vector.extract_strided_slice %14 {offsets = [0, 0, 0], sizes = [1, 16, 64], strides = [1, 1, 1]} : vector<2x16x64xf32> to vector<1x16x64xf32>
    %16 = vector.shape_cast %15 : vector<1x16x64xf32> to vector<16x64xf32>
    %17 = vector.extract_strided_slice %14 {offsets = [1, 0, 0], sizes = [1, 16, 64], strides = [1, 1, 1]} : vector<2x16x64xf32> to vector<1x16x64xf32>
    %18 = vector.shape_cast %17 : vector<1x16x64xf32> to vector<16x64xf32>
    %19 = tpu.concatenate %16, %18 in 1 : vector<16x64xf32>, vector<16x64xf32> -> vector<16x128xf32>
    %20 = vector.extract_strided_slice %12 {offsets = [0, 64], sizes = [32, 64], strides = [1, 1]} : vector<32x128xf32> to vector<32x64xf32>
    %c20 = arith.constant 20 : index
    %c0_6 = arith.constant 0 : index
    %21 = vector.load %arg3[%c20, %c0_6] : memref<23x128xf32, #tpu.memory_space<vmem>>, vector<1x128xf32>
    %c19 = arith.constant 19 : index
    %c0_7 = arith.constant 0 : index
    %22 = vector.load %arg3[%c19, %c0_7] : memref<23x128xf32, #tpu.memory_space<vmem>>, vector<1x128xf32>
    %23 = vector.broadcast %22 : vector<1x128xf32> to vector<16x128xf32>
    %24 = arith.mulf %23, %19 : vector<16x128xf32>
    %25 = vector.broadcast %21 : vector<1x128xf32> to vector<16x128xf32>
    %26 = arith.addf %24, %25 : vector<16x128xf32>
    %27 = tpu.iota {dimensions = array<i32: 0>} : vector<16x128xi32>
    %c3_i32 = arith.constant 3 : i32
    %28 = tpu.dynamic_rotate %19 by %c3_i32 dim 0 : vector<16x128xf32>, i32 -> vector<16x128xf32>
    %c3_i32_8 = arith.constant 3 : i32
    %29 = vector.broadcast %c3_i32_8 : i32 to vector<16x128xi32>
    %30 = arith.cmpi slt, %27, %29 : vector<16x128xi32>
    %cst_9 = arith.constant 0.000000e+00 : f32
    %31 = vector.broadcast %cst_9 : f32 to vector<16x128xf32>
    %32 = arith.select %30, %31, %28 : vector<16x128xi1>, vector<16x128xf32>
    %c16 = arith.constant 16 : index
    %c0_10 = arith.constant 0 : index
    %33 = vector.load %arg3[%c16, %c0_10] : memref<23x128xf32, #tpu.memory_space<vmem>>, vector<1x128xf32>
    %34 = vector.broadcast %33 : vector<1x128xf32> to vector<16x128xf32>
    %35 = arith.mulf %34, %32 : vector<16x128xf32>
    %36 = arith.addf %26, %35 : vector<16x128xf32>
    %c2_i32 = arith.constant 2 : i32
    %37 = tpu.dynamic_rotate %19 by %c2_i32 dim 0 : vector<16x128xf32>, i32 -> vector<16x128xf32>
    %c2_i32_11 = arith.constant 2 : i32
    %38 = vector.broadcast %c2_i32_11 : i32 to vector<16x128xi32>
    %39 = arith.cmpi slt, %27, %38 : vector<16x128xi32>
    %cst_12 = arith.constant 0.000000e+00 : f32
    %40 = vector.broadcast %cst_12 : f32 to vector<16x128xf32>
    %41 = arith.select %39, %40, %37 : vector<16x128xi1>, vector<16x128xf32>
    %c17 = arith.constant 17 : index
    %c0_13 = arith.constant 0 : index
    %42 = vector.load %arg3[%c17, %c0_13] : memref<23x128xf32, #tpu.memory_space<vmem>>, vector<1x128xf32>
    %43 = vector.broadcast %42 : vector<1x128xf32> to vector<16x128xf32>
    %44 = arith.mulf %43, %41 : vector<16x128xf32>
    %45 = arith.addf %36, %44 : vector<16x128xf32>
    %c1_i32 = arith.constant 1 : i32
    %46 = tpu.dynamic_rotate %19 by %c1_i32 dim 0 : vector<16x128xf32>, i32 -> vector<16x128xf32>
    %c1_i32_14 = arith.constant 1 : i32
    %47 = vector.broadcast %c1_i32_14 : i32 to vector<16x128xi32>
    %48 = arith.cmpi slt, %27, %47 : vector<16x128xi32>
    %cst_15 = arith.constant 0.000000e+00 : f32
    %49 = vector.broadcast %cst_15 : f32 to vector<16x128xf32>
    %50 = arith.select %48, %49, %46 : vector<16x128xi1>, vector<16x128xf32>
    %c18 = arith.constant 18 : index
    %c0_16 = arith.constant 0 : index
    %51 = vector.load %arg3[%c18, %c0_16] : memref<23x128xf32, #tpu.memory_space<vmem>>, vector<1x128xf32>
    %52 = vector.broadcast %51 : vector<1x128xf32> to vector<16x128xf32>
    %53 = arith.mulf %52, %50 : vector<16x128xf32>
    %54 = arith.addf %45, %53 : vector<16x128xf32>
    %cst_17 = arith.constant 5.000000e-01 : f32
    %55 = vector.broadcast %cst_17 : f32 to vector<16x128xf32>
    %56 = arith.mulf %55, %54 : vector<16x128xf32>
    %57 = math.tanh %56 : vector<16x128xf32>
    %cst_18 = arith.constant 5.000000e-01 : f32
    %58 = vector.broadcast %cst_18 : f32 to vector<16x128xf32>
    %59 = arith.mulf %58, %57 : vector<16x128xf32>
    %cst_19 = arith.constant 5.000000e-01 : f32
    %60 = vector.broadcast %cst_19 : f32 to vector<16x128xf32>
    %61 = arith.addf %59, %60 : vector<16x128xf32>
    %62 = arith.mulf %54, %61 : vector<16x128xf32>
    %63 = vector.extract_strided_slice %62 {offsets = [0, 0], sizes = [16, 64], strides = [1, 1]} : vector<16x128xf32> to vector<16x64xf32>
    %64 = vector.extract_strided_slice %62 {offsets = [0, 64], sizes = [16, 64], strides = [1, 1]} : vector<16x128xf32> to vector<16x64xf32>
    %65 = tpu.concatenate %63, %64 in 0 : vector<16x64xf32>, vector<16x64xf32> -> vector<32x64xf32>
    %c0_20 = arith.constant 0 : index
    %c0_21 = arith.constant 0 : index
    %66 = vector.load %arg5[%c0_20, %c0_21] : memref<64x32xf32, #tpu.memory_space<vmem>>, vector<64x32xf32>
    %cst_22 = arith.constant dense<0.000000e+00> : vector<32x32xf32>
    %67 = tpu.matmul %65, %66, %cst_22 {dimension_numbers = #tpu.dot_dimension_numbers<[1], [0], [0], [1], [0, 0, 1, 1], [], []>} : vector<32x64xf32>, vector<64x32xf32>, vector<32x32xf32> -> vector<32x32xf32>
    %c0_23 = arith.constant 0 : index
    %c0_24 = arith.constant 0 : index
    %68 = vector.load %arg4[%c0_23, %c0_24] : memref<64x64xf32, #tpu.memory_space<vmem>>, vector<64x64xf32>
    %cst_25 = arith.constant dense<0.000000e+00> : vector<32x64xf32>
    %69 = tpu.matmul %65, %68, %cst_25 {dimension_numbers = #tpu.dot_dimension_numbers<[1], [0], [0], [1], [0, 0, 1, 1], [], []>} : vector<32x64xf32>, vector<64x64xf32>, vector<32x64xf32> -> vector<32x64xf32>
    %70 = vector.shape_cast %69 : vector<32x64xf32> to vector<2x16x64xf32>
    %71 = vector.extract_strided_slice %70 {offsets = [0, 0, 0], sizes = [1, 16, 64], strides = [1, 1, 1]} : vector<2x16x64xf32> to vector<1x16x64xf32>
    %72 = vector.shape_cast %71 : vector<1x16x64xf32> to vector<16x64xf32>
    %73 = vector.extract_strided_slice %70 {offsets = [1, 0, 0], sizes = [1, 16, 64], strides = [1, 1, 1]} : vector<2x16x64xf32> to vector<1x16x64xf32>
    %74 = vector.shape_cast %73 : vector<1x16x64xf32> to vector<16x64xf32>
    %75 = tpu.concatenate %72, %74 in 1 : vector<16x64xf32>, vector<16x64xf32> -> vector<16x128xf32>
    %c21 = arith.constant 21 : index
    %c0_26 = arith.constant 0 : index
    %76 = vector.load %arg3[%c21, %c0_26] : memref<23x128xf32, #tpu.memory_space<vmem>>, vector<1x128xf32>
    %77 = vector.broadcast %76 : vector<1x128xf32> to vector<16x128xf32>
    %78 = arith.addf %75, %77 : vector<16x128xf32>
    %cst_27 = arith.constant 0.000000e+00 : f32
    %79 = vector.broadcast %cst_27 : f32 to vector<16x128xf32>
    %80 = arith.maximumf %78, %79 : vector<16x128xf32>
    %81 = math.absf %78 : vector<16x128xf32>
    %cst_28 = arith.constant 0.000000e+00 : f32
    %82 = vector.broadcast %cst_28 : f32 to vector<16x128xf32>
    %83 = arith.subf %82, %81 : vector<16x128xf32>
    %84 = math.exp %83 : vector<16x128xf32>
    %cst_29 = arith.constant 1.000000e+00 : f32
    %85 = vector.broadcast %cst_29 : f32 to vector<16x128xf32>
    %86 = arith.addf %85, %84 : vector<16x128xf32>
    %87 = math.log %86 : vector<16x128xf32>
    %88 = arith.addf %80, %87 : vector<16x128xf32>
    %c0_30 = arith.constant 0 : index
    %c0_31 = arith.constant 0 : index
    %89 = vector.load %arg3[%c0_30, %c0_31] : memref<23x128xf32, #tpu.memory_space<vmem>>, vector<16x128xf32>
    %90 = vector.shape_cast %88 : vector<16x128xf32> to vector<16x1x128xf32>
    %91 = vector.shape_cast %89 : vector<16x128xf32> to vector<1x16x128xf32>
    %92 = vector.broadcast %90 : vector<16x1x128xf32> to vector<16x16x128xf32>
    %93 = vector.broadcast %91 : vector<1x16x128xf32> to vector<16x16x128xf32>
    %94 = arith.mulf %92, %93 : vector<16x16x128xf32>
    %95 = math.exp %94 : vector<16x16x128xf32>
    %c0_32 = arith.constant 0 : index
    %c0_33 = arith.constant 0 : index
    %c0_34 = arith.constant 0 : index
    %96 = vector.load %arg8[%c0_32, %c0_33, %c0_34] : memref<16x16x128xf32, #tpu.memory_space<vmem>>, vector<16x16x128xf32>
    tpu.vector_store %arg8[%c0_32, %c0_33, %c0_34], %95 {strides = array<i32>} : memref<16x16x128xf32, #tpu.memory_space<vmem>>, vector<16x16x128xf32>,
    %97 = vector.shape_cast %67 : vector<32x32xf32> to vector<2x16x32xf32>
    %98 = arith.mulf %88, %62 : vector<16x128xf32>
    %99 = vector.shape_cast %98 : vector<16x128xf32> to vector<16x1x128xf32>
    %100 = vector.extract_strided_slice %97 {offsets = [0, 0, 0], sizes = [1, 16, 16], strides = [1, 1, 1]} : vector<2x16x32xf32> to vector<1x16x16xf32>
    %101 = vector.shape_cast %100 : vector<1x16x16xf32> to vector<16x16xf32>
    %102 = vector.shape_cast %101 : vector<16x16xf32> to vector<16x16x1xf32>
    %103 = vector.shape_cast %102 : vector<16x16x1xf32> to vector<16x16x1xf32>
    %104 = vector.broadcast %103 : vector<16x16x1xf32> to vector<16x16x64xf32>
    %105 = vector.extract_strided_slice %97 {offsets = [1, 0, 0], sizes = [1, 16, 16], strides = [1, 1, 1]} : vector<2x16x32xf32> to vector<1x16x16xf32>
    %106 = vector.shape_cast %105 : vector<1x16x16xf32> to vector<16x16xf32>
    %107 = vector.shape_cast %106 : vector<16x16xf32> to vector<16x16x1xf32>
    %108 = vector.shape_cast %107 : vector<16x16x1xf32> to vector<16x16x1xf32>
    %109 = vector.broadcast %108 : vector<16x16x1xf32> to vector<16x16x64xf32>
    %110 = tpu.concatenate %104, %109 in 2 : vector<16x16x64xf32>, vector<16x16x64xf32> -> vector<16x16x128xf32>
    %111 = vector.broadcast %99 : vector<16x1x128xf32> to vector<16x16x128xf32>
    %112 = arith.mulf %111, %110 : vector<16x16x128xf32>
    %c0_35 = arith.constant 0 : index
    %c0_36 = arith.constant 0 : index
    %c0_37 = arith.constant 0 : index
    %113 = vector.load %arg9[%c0_35, %c0_36, %c0_37] : memref<16x16x128xf32, #tpu.memory_space<vmem>>, vector<16x16x128xf32>
    tpu.vector_store %arg9[%c0_35, %c0_36, %c0_37], %112 {strides = array<i32>} : memref<16x16x128xf32, #tpu.memory_space<vmem>>, vector<16x16x128xf32>,
    %cst_38 = arith.constant 0.000000e+00 : f32
    %114 = vector.broadcast %cst_38 : f32 to vector<16x128xf32>
    %c0_39 = arith.constant 0 : index
    %c0_40 = arith.constant 0 : index
    %c0_41 = arith.constant 0 : index
    %115 = vector.load %arg8[%c0_39, %c0_40, %c0_41] : memref<16x16x128xf32, #tpu.memory_space<vmem>>, vector<1x16x128xf32>
    %116 = vector.shape_cast %115 : vector<1x16x128xf32> to vector<16x128xf32>
    %117 = arith.mulf %116, %114 : vector<16x128xf32>
    %c0_42 = arith.constant 0 : index
    %c0_43 = arith.constant 0 : index
    %c0_44 = arith.constant 0 : index
    %118 = vector.load %arg9[%c0_42, %c0_43, %c0_44] : memref<16x16x128xf32, #tpu.memory_space<vmem>>, vector<1x16x128xf32>
    %119 = vector.shape_cast %118 : vector<1x16x128xf32> to vector<16x128xf32>
    %120 = arith.addf %117, %119 : vector<16x128xf32>
    %c0_45 = arith.constant 0 : index
    %c0_46 = arith.constant 0 : index
    %c0_47 = arith.constant 0 : index
    %121 = vector.load %arg10[%c0_45, %c0_46, %c0_47] : memref<16x16x128xf32, #tpu.memory_space<vmem>>, vector<1x16x128xf32>
    %122 = vector.shape_cast %121 : vector<1x16x128xf32> to vector<16x128xf32>
    %123 = vector.shape_cast %120 : vector<16x128xf32> to vector<1x16x128xf32>
    tpu.vector_store %arg10[%c0_45, %c0_46, %c0_47], %123 {strides = array<i32>} : memref<16x16x128xf32, #tpu.memory_space<vmem>>, vector<1x16x128xf32>,
    %c1 = arith.constant 1 : index
    %c0_48 = arith.constant 0 : index
    %c0_49 = arith.constant 0 : index
    %124 = vector.load %arg8[%c1, %c0_48, %c0_49] : memref<16x16x128xf32, #tpu.memory_space<vmem>>, vector<1x16x128xf32>
    %125 = vector.shape_cast %124 : vector<1x16x128xf32> to vector<16x128xf32>
    %126 = arith.mulf %125, %120 : vector<16x128xf32>
    %c1_50 = arith.constant 1 : index
    %c0_51 = arith.constant 0 : index
    %c0_52 = arith.constant 0 : index
    %127 = vector.load %arg9[%c1_50, %c0_51, %c0_52] : memref<16x16x128xf32, #tpu.memory_space<vmem>>, vector<1x16x128xf32>
    %128 = vector.shape_cast %127 : vector<1x16x128xf32> to vector<16x128xf32>
    %129 = arith.addf %126, %128 : vector<16x128xf32>
    %c1_53 = arith.constant 1 : index
    %c0_54 = arith.constant 0 : index
    %c0_55 = arith.constant 0 : index
    %130 = vector.load %arg10[%c1_53, %c0_54, %c0_55] : memref<16x16x128xf32, #tpu.memory_space<vmem>>, vector<1x16x128xf32>
    %131 = vector.shape_cast %130 : vector<1x16x128xf32> to vector<16x128xf32>
    %132 = vector.shape_cast %129 : vector<16x128xf32> to vector<1x16x128xf32>
    tpu.vector_store %arg10[%c1_53, %c0_54, %c0_55], %132 {strides = array<i32>} : memref<16x16x128xf32, #tpu.memory_space<vmem>>, vector<1x16x128xf32>,
    %c2 = arith.constant 2 : index
    %c0_56 = arith.constant 0 : index
    %c0_57 = arith.constant 0 : index
    %133 = vector.load %arg8[%c2, %c0_56, %c0_57] : memref<16x16x128xf32, #tpu.memory_space<vmem>>, vector<1x16x128xf32>
    %134 = vector.shape_cast %133 : vector<1x16x128xf32> to vector<16x128xf32>
    %135 = arith.mulf %134, %129 : vector<16x128xf32>
    %c2_58 = arith.constant 2 : index
    %c0_59 = arith.constant 0 : index
    %c0_60 = arith.constant 0 : index
    %136 = vector.load %arg9[%c2_58, %c0_59, %c0_60] : memref<16x16x128xf32, #tpu.memory_space<vmem>>, vector<1x16x128xf32>
    %137 = vector.shape_cast %136 : vector<1x16x128xf32> to vector<16x128xf32>
    %138 = arith.addf %135, %137 : vector<16x128xf32>
    %c2_61 = arith.constant 2 : index
    %c0_62 = arith.constant 0 : index
    %c0_63 = arith.constant 0 : index
    %139 = vector.load %arg10[%c2_61, %c0_62, %c0_63] : memref<16x16x128xf32, #tpu.memory_space<vmem>>, vector<1x16x128xf32>
    %140 = vector.shape_cast %139 : vector<1x16x128xf32> to vector<16x128xf32>
    %141 = vector.shape_cast %138 : vector<16x128xf32> to vector<1x16x128xf32>
    tpu.vector_store %arg10[%c2_61, %c0_62, %c0_63], %141 {strides = array<i32>} : memref<16x16x128xf32, #tpu.memory_space<vmem>>, vector<1x16x128xf32>,
    %c3 = arith.constant 3 : index
    %c0_64 = arith.constant 0 : index
    %c0_65 = arith.constant 0 : index
    %142 = vector.load %arg8[%c3, %c0_64, %c0_65] : memref<16x16x128xf32, #tpu.memory_space<vmem>>, vector<1x16x128xf32>
    %143 = vector.shape_cast %142 : vector<1x16x128xf32> to vector<16x128xf32>
    %144 = arith.mulf %143, %138 : vector<16x128xf32>
    %c3_66 = arith.constant 3 : index
    %c0_67 = arith.constant 0 : index
    %c0_68 = arith.constant 0 : index
    %145 = vector.load %arg9[%c3_66, %c0_67, %c0_68] : memref<16x16x128xf32, #tpu.memory_space<vmem>>, vector<1x16x128xf32>
    %146 = vector.shape_cast %145 : vector<1x16x128xf32> to vector<16x128xf32>
    %147 = arith.addf %144, %146 : vector<16x128xf32>
    %c3_69 = arith.constant 3 : index
    %c0_70 = arith.constant 0 : index
    %c0_71 = arith.constant 0 : index
    %148 = vector.load %arg10[%c3_69, %c0_70, %c0_71] : memref<16x16x128xf32, #tpu.memory_space<vmem>>, vector<1x16x128xf32>
    %149 = vector.shape_cast %148 : vector<1x16x128xf32> to vector<16x128xf32>
    %150 = vector.shape_cast %147 : vector<16x128xf32> to vector<1x16x128xf32>
    tpu.vector_store %arg10[%c3_69, %c0_70, %c0_71], %150 {strides = array<i32>} : memref<16x16x128xf32, #tpu.memory_space<vmem>>, vector<1x16x128xf32>,
    %c4 = arith.constant 4 : index
    %c0_72 = arith.constant 0 : index
    %c0_73 = arith.constant 0 : index
    %151 = vector.load %arg8[%c4, %c0_72, %c0_73] : memref<16x16x128xf32, #tpu.memory_space<vmem>>, vector<1x16x128xf32>
    %152 = vector.shape_cast %151 : vector<1x16x128xf32> to vector<16x128xf32>
    %153 = arith.mulf %152, %147 : vector<16x128xf32>
    %c4_74 = arith.constant 4 : index
    %c0_75 = arith.constant 0 : index
    %c0_76 = arith.constant 0 : index
    %154 = vector.load %arg9[%c4_74, %c0_75, %c0_76] : memref<16x16x128xf32, #tpu.memory_space<vmem>>, vector<1x16x128xf32>
    %155 = vector.shape_cast %154 : vector<1x16x128xf32> to vector<16x128xf32>
    %156 = arith.addf %153, %155 : vector<16x128xf32>
    %c4_77 = arith.constant 4 : index
    %c0_78 = arith.constant 0 : index
    %c0_79 = arith.constant 0 : index
    %157 = vector.load %arg10[%c4_77, %c0_78, %c0_79] : memref<16x16x128xf32, #tpu.memory_space<vmem>>, vector<1x16x128xf32>
    %158 = vector.shape_cast %157 : vector<1x16x128xf32> to vector<16x128xf32>
    %159 = vector.shape_cast %156 : vector<16x128xf32> to vector<1x16x128xf32>
    tpu.vector_store %arg10[%c4_77, %c0_78, %c0_79], %159 {strides = array<i32>} : memref<16x16x128xf32, #tpu.memory_space<vmem>>, vector<1x16x128xf32>,
    %c5 = arith.constant 5 : index
    %c0_80 = arith.constant 0 : index
    %c0_81 = arith.constant 0 : index
    %160 = vector.load %arg8[%c5, %c0_80, %c0_81] : memref<16x16x128xf32, #tpu.memory_space<vmem>>, vector<1x16x128xf32>
    %161 = vector.shape_cast %160 : vector<1x16x128xf32> to vector<16x128xf32>
    %162 = arith.mulf %161, %156 : vector<16x128xf32>
    %c5_82 = arith.constant 5 : index
    %c0_83 = arith.constant 0 : index
    %c0_84 = arith.constant 0 : index
    %163 = vector.load %arg9[%c5_82, %c0_83, %c0_84] : memref<16x16x128xf32, #tpu.memory_space<vmem>>, vector<1x16x128xf32>
    %164 = vector.shape_cast %163 : vector<1x16x128xf32> to vector<16x128xf32>
    %165 = arith.addf %162, %164 : vector<16x128xf32>
    %c5_85 = arith.constant 5 : index
    %c0_86 = arith.constant 0 : index
    %c0_87 = arith.constant 0 : index
    %166 = vector.load %arg10[%c5_85, %c0_86, %c0_87] : memref<16x16x128xf32, #tpu.memory_space<vmem>>, vector<1x16x128xf32>
    %167 = vector.shape_cast %166 : vector<1x16x128xf32> to vector<16x128xf32>
    %168 = vector.shape_cast %165 : vector<16x128xf32> to vector<1x16x128xf32>
    tpu.vector_store %arg10[%c5_85, %c0_86, %c0_87], %168 {strides = array<i32>} : memref<16x16x128xf32, #tpu.memory_space<vmem>>, vector<1x16x128xf32>,
    %c6 = arith.constant 6 : index
    %c0_88 = arith.constant 0 : index
    %c0_89 = arith.constant 0 : index
    %169 = vector.load %arg8[%c6, %c0_88, %c0_89] : memref<16x16x128xf32, #tpu.memory_space<vmem>>, vector<1x16x128xf32>
    %170 = vector.shape_cast %169 : vector<1x16x128xf32> to vector<16x128xf32>
    %171 = arith.mulf %170, %165 : vector<16x128xf32>
    %c6_90 = arith.constant 6 : index
    %c0_91 = arith.constant 0 : index
    %c0_92 = arith.constant 0 : index
    %172 = vector.load %arg9[%c6_90, %c0_91, %c0_92] : memref<16x16x128xf32, #tpu.memory_space<vmem>>, vector<1x16x128xf32>
    %173 = vector.shape_cast %172 : vector<1x16x128xf32> to vector<16x128xf32>
    %174 = arith.addf %171, %173 : vector<16x128xf32>
    %c6_93 = arith.constant 6 : index
    %c0_94 = arith.constant 0 : index
    %c0_95 = arith.constant 0 : index
    %175 = vector.load %arg10[%c6_93, %c0_94, %c0_95] : memref<16x16x128xf32, #tpu.memory_space<vmem>>, vector<1x16x128xf32>
    %176 = vector.shape_cast %175 : vector<1x16x128xf32> to vector<16x128xf32>
    %177 = vector.shape_cast %174 : vector<16x128xf32> to vector<1x16x128xf32>
    tpu.vector_store %arg10[%c6_93, %c0_94, %c0_95], %177 {strides = array<i32>} : memref<16x16x128xf32, #tpu.memory_space<vmem>>, vector<1x16x128xf32>,
    %c7 = arith.constant 7 : index
    %c0_96 = arith.constant 0 : index
    %c0_97 = arith.constant 0 : index
    %178 = vector.load %arg8[%c7, %c0_96, %c0_97] : memref<16x16x128xf32, #tpu.memory_space<vmem>>, vector<1x16x128xf32>
    %179 = vector.shape_cast %178 : vector<1x16x128xf32> to vector<16x128xf32>
    %180 = arith.mulf %179, %174 : vector<16x128xf32>
    %c7_98 = arith.constant 7 : index
    %c0_99 = arith.constant 0 : index
    %c0_100 = arith.constant 0 : index
    %181 = vector.load %arg9[%c7_98, %c0_99, %c0_100] : memref<16x16x128xf32, #tpu.memory_space<vmem>>, vector<1x16x128xf32>
    %182 = vector.shape_cast %181 : vector<1x16x128xf32> to vector<16x128xf32>
    %183 = arith.addf %180, %182 : vector<16x128xf32>
    %c7_101 = arith.constant 7 : index
    %c0_102 = arith.constant 0 : index
    %c0_103 = arith.constant 0 : index
    %184 = vector.load %arg10[%c7_101, %c0_102, %c0_103] : memref<16x16x128xf32, #tpu.memory_space<vmem>>, vector<1x16x128xf32>
    %185 = vector.shape_cast %184 : vector<1x16x128xf32> to vector<16x128xf32>
    %186 = vector.shape_cast %183 : vector<16x128xf32> to vector<1x16x128xf32>
    tpu.vector_store %arg10[%c7_101, %c0_102, %c0_103], %186 {strides = array<i32>} : memref<16x16x128xf32, #tpu.memory_space<vmem>>, vector<1x16x128xf32>,
    %c8 = arith.constant 8 : index
    %c0_104 = arith.constant 0 : index
    %c0_105 = arith.constant 0 : index
    %187 = vector.load %arg8[%c8, %c0_104, %c0_105] : memref<16x16x128xf32, #tpu.memory_space<vmem>>, vector<1x16x128xf32>
    %188 = vector.shape_cast %187 : vector<1x16x128xf32> to vector<16x128xf32>
    %189 = arith.mulf %188, %183 : vector<16x128xf32>
    %c8_106 = arith.constant 8 : index
    %c0_107 = arith.constant 0 : index
    %c0_108 = arith.constant 0 : index
    %190 = vector.load %arg9[%c8_106, %c0_107, %c0_108] : memref<16x16x128xf32, #tpu.memory_space<vmem>>, vector<1x16x128xf32>
    %191 = vector.shape_cast %190 : vector<1x16x128xf32> to vector<16x128xf32>
    %192 = arith.addf %189, %191 : vector<16x128xf32>
    %c8_109 = arith.constant 8 : index
    %c0_110 = arith.constant 0 : index
    %c0_111 = arith.constant 0 : index
    %193 = vector.load %arg10[%c8_109, %c0_110, %c0_111] : memref<16x16x128xf32, #tpu.memory_space<vmem>>, vector<1x16x128xf32>
    %194 = vector.shape_cast %193 : vector<1x16x128xf32> to vector<16x128xf32>
    %195 = vector.shape_cast %192 : vector<16x128xf32> to vector<1x16x128xf32>
    tpu.vector_store %arg10[%c8_109, %c0_110, %c0_111], %195 {strides = array<i32>} : memref<16x16x128xf32, #tpu.memory_space<vmem>>, vector<1x16x128xf32>,
    %c9 = arith.constant 9 : index
    %c0_112 = arith.constant 0 : index
    %c0_113 = arith.constant 0 : index
    %196 = vector.load %arg8[%c9, %c0_112, %c0_113] : memref<16x16x128xf32, #tpu.memory_space<vmem>>, vector<1x16x128xf32>
    %197 = vector.shape_cast %196 : vector<1x16x128xf32> to vector<16x128xf32>
    %198 = arith.mulf %197, %192 : vector<16x128xf32>
    %c9_114 = arith.constant 9 : index
    %c0_115 = arith.constant 0 : index
    %c0_116 = arith.constant 0 : index
    %199 = vector.load %arg9[%c9_114, %c0_115, %c0_116] : memref<16x16x128xf32, #tpu.memory_space<vmem>>, vector<1x16x128xf32>
    %200 = vector.shape_cast %199 : vector<1x16x128xf32> to vector<16x128xf32>
    %201 = arith.addf %198, %200 : vector<16x128xf32>
    %c9_117 = arith.constant 9 : index
    %c0_118 = arith.constant 0 : index
    %c0_119 = arith.constant 0 : index
    %202 = vector.load %arg10[%c9_117, %c0_118, %c0_119] : memref<16x16x128xf32, #tpu.memory_space<vmem>>, vector<1x16x128xf32>
    %203 = vector.shape_cast %202 : vector<1x16x128xf32> to vector<16x128xf32>
    %204 = vector.shape_cast %201 : vector<16x128xf32> to vector<1x16x128xf32>
    tpu.vector_store %arg10[%c9_117, %c0_118, %c0_119], %204 {strides = array<i32>} : memref<16x16x128xf32, #tpu.memory_space<vmem>>, vector<1x16x128xf32>,
    %c10 = arith.constant 10 : index
    %c0_120 = arith.constant 0 : index
    %c0_121 = arith.constant 0 : index
    %205 = vector.load %arg8[%c10, %c0_120, %c0_121] : memref<16x16x128xf32, #tpu.memory_space<vmem>>, vector<1x16x128xf32>
    %206 = vector.shape_cast %205 : vector<1x16x128xf32> to vector<16x128xf32>
    %207 = arith.mulf %206, %201 : vector<16x128xf32>
    %c10_122 = arith.constant 10 : index
    %c0_123 = arith.constant 0 : index
    %c0_124 = arith.constant 0 : index
    %208 = vector.load %arg9[%c10_122, %c0_123, %c0_124] : memref<16x16x128xf32, #tpu.memory_space<vmem>>, vector<1x16x128xf32>
    %209 = vector.shape_cast %208 : vector<1x16x128xf32> to vector<16x128xf32>
    %210 = arith.addf %207, %209 : vector<16x128xf32>
    %c10_125 = arith.constant 10 : index
    %c0_126 = arith.constant 0 : index
    %c0_127 = arith.constant 0 : index
    %211 = vector.load %arg10[%c10_125, %c0_126, %c0_127] : memref<16x16x128xf32, #tpu.memory_space<vmem>>, vector<1x16x128xf32>
    %212 = vector.shape_cast %211 : vector<1x16x128xf32> to vector<16x128xf32>
    %213 = vector.shape_cast %210 : vector<16x128xf32> to vector<1x16x128xf32>
    tpu.vector_store %arg10[%c10_125, %c0_126, %c0_127], %213 {strides = array<i32>} : memref<16x16x128xf32, #tpu.memory_space<vmem>>, vector<1x16x128xf32>,
    %c11 = arith.constant 11 : index
    %c0_128 = arith.constant 0 : index
    %c0_129 = arith.constant 0 : index
    %214 = vector.load %arg8[%c11, %c0_128, %c0_129] : memref<16x16x128xf32, #tpu.memory_space<vmem>>, vector<1x16x128xf32>
    %215 = vector.shape_cast %214 : vector<1x16x128xf32> to vector<16x128xf32>
    %216 = arith.mulf %215, %210 : vector<16x128xf32>
    %c11_130 = arith.constant 11 : index
    %c0_131 = arith.constant 0 : index
    %c0_132 = arith.constant 0 : index
    %217 = vector.load %arg9[%c11_130, %c0_131, %c0_132] : memref<16x16x128xf32, #tpu.memory_space<vmem>>, vector<1x16x128xf32>
    %218 = vector.shape_cast %217 : vector<1x16x128xf32> to vector<16x128xf32>
    %219 = arith.addf %216, %218 : vector<16x128xf32>
    %c11_133 = arith.constant 11 : index
    %c0_134 = arith.constant 0 : index
    %c0_135 = arith.constant 0 : index
    %220 = vector.load %arg10[%c11_133, %c0_134, %c0_135] : memref<16x16x128xf32, #tpu.memory_space<vmem>>, vector<1x16x128xf32>
    %221 = vector.shape_cast %220 : vector<1x16x128xf32> to vector<16x128xf32>
    %222 = vector.shape_cast %219 : vector<16x128xf32> to vector<1x16x128xf32>
    tpu.vector_store %arg10[%c11_133, %c0_134, %c0_135], %222 {strides = array<i32>} : memref<16x16x128xf32, #tpu.memory_space<vmem>>, vector<1x16x128xf32>,
    %c12 = arith.constant 12 : index
    %c0_136 = arith.constant 0 : index
    %c0_137 = arith.constant 0 : index
    %223 = vector.load %arg8[%c12, %c0_136, %c0_137] : memref<16x16x128xf32, #tpu.memory_space<vmem>>, vector<1x16x128xf32>
    %224 = vector.shape_cast %223 : vector<1x16x128xf32> to vector<16x128xf32>
    %225 = arith.mulf %224, %219 : vector<16x128xf32>
    %c12_138 = arith.constant 12 : index
    %c0_139 = arith.constant 0 : index
    %c0_140 = arith.constant 0 : index
    %226 = vector.load %arg9[%c12_138, %c0_139, %c0_140] : memref<16x16x128xf32, #tpu.memory_space<vmem>>, vector<1x16x128xf32>
    %227 = vector.shape_cast %226 : vector<1x16x128xf32> to vector<16x128xf32>
    %228 = arith.addf %225, %227 : vector<16x128xf32>
    %c12_141 = arith.constant 12 : index
    %c0_142 = arith.constant 0 : index
    %c0_143 = arith.constant 0 : index
    %229 = vector.load %arg10[%c12_141, %c0_142, %c0_143] : memref<16x16x128xf32, #tpu.memory_space<vmem>>, vector<1x16x128xf32>
    %230 = vector.shape_cast %229 : vector<1x16x128xf32> to vector<16x128xf32>
    %231 = vector.shape_cast %228 : vector<16x128xf32> to vector<1x16x128xf32>
    tpu.vector_store %arg10[%c12_141, %c0_142, %c0_143], %231 {strides = array<i32>} : memref<16x16x128xf32, #tpu.memory_space<vmem>>, vector<1x16x128xf32>,
    %c13 = arith.constant 13 : index
    %c0_144 = arith.constant 0 : index
    %c0_145 = arith.constant 0 : index
    %232 = vector.load %arg8[%c13, %c0_144, %c0_145] : memref<16x16x128xf32, #tpu.memory_space<vmem>>, vector<1x16x128xf32>
    %233 = vector.shape_cast %232 : vector<1x16x128xf32> to vector<16x128xf32>
    %234 = arith.mulf %233, %228 : vector<16x128xf32>
    %c13_146 = arith.constant 13 : index
    %c0_147 = arith.constant 0 : index
    %c0_148 = arith.constant 0 : index
    %235 = vector.load %arg9[%c13_146, %c0_147, %c0_148] : memref<16x16x128xf32, #tpu.memory_space<vmem>>, vector<1x16x128xf32>
    %236 = vector.shape_cast %235 : vector<1x16x128xf32> to vector<16x128xf32>
    %237 = arith.addf %234, %236 : vector<16x128xf32>
    %c13_149 = arith.constant 13 : index
    %c0_150 = arith.constant 0 : index
    %c0_151 = arith.constant 0 : index
    %238 = vector.load %arg10[%c13_149, %c0_150, %c0_151] : memref<16x16x128xf32, #tpu.memory_space<vmem>>, vector<1x16x128xf32>
    %239 = vector.shape_cast %238 : vector<1x16x128xf32> to vector<16x128xf32>
    %240 = vector.shape_cast %237 : vector<16x128xf32> to vector<1x16x128xf32>
    tpu.vector_store %arg10[%c13_149, %c0_150, %c0_151], %240 {strides = array<i32>} : memref<16x16x128xf32, #tpu.memory_space<vmem>>, vector<1x16x128xf32>,
    %c14 = arith.constant 14 : index
    %c0_152 = arith.constant 0 : index
    %c0_153 = arith.constant 0 : index
    %241 = vector.load %arg8[%c14, %c0_152, %c0_153] : memref<16x16x128xf32, #tpu.memory_space<vmem>>, vector<1x16x128xf32>
    %242 = vector.shape_cast %241 : vector<1x16x128xf32> to vector<16x128xf32>
    %243 = arith.mulf %242, %237 : vector<16x128xf32>
    %c14_154 = arith.constant 14 : index
    %c0_155 = arith.constant 0 : index
    %c0_156 = arith.constant 0 : index
    %244 = vector.load %arg9[%c14_154, %c0_155, %c0_156] : memref<16x16x128xf32, #tpu.memory_space<vmem>>, vector<1x16x128xf32>
    %245 = vector.shape_cast %244 : vector<1x16x128xf32> to vector<16x128xf32>
    %246 = arith.addf %243, %245 : vector<16x128xf32>
    %c14_157 = arith.constant 14 : index
    %c0_158 = arith.constant 0 : index
    %c0_159 = arith.constant 0 : index
    %247 = vector.load %arg10[%c14_157, %c0_158, %c0_159] : memref<16x16x128xf32, #tpu.memory_space<vmem>>, vector<1x16x128xf32>
    %248 = vector.shape_cast %247 : vector<1x16x128xf32> to vector<16x128xf32>
    %249 = vector.shape_cast %246 : vector<16x128xf32> to vector<1x16x128xf32>
    tpu.vector_store %arg10[%c14_157, %c0_158, %c0_159], %249 {strides = array<i32>} : memref<16x16x128xf32, #tpu.memory_space<vmem>>, vector<1x16x128xf32>,
    %c15 = arith.constant 15 : index
    %c0_160 = arith.constant 0 : index
    %c0_161 = arith.constant 0 : index
    %250 = vector.load %arg8[%c15, %c0_160, %c0_161] : memref<16x16x128xf32, #tpu.memory_space<vmem>>, vector<1x16x128xf32>
    %251 = vector.shape_cast %250 : vector<1x16x128xf32> to vector<16x128xf32>
    %252 = arith.mulf %251, %246 : vector<16x128xf32>
    %c15_162 = arith.constant 15 : index
    %c0_163 = arith.constant 0 : index
    %c0_164 = arith.constant 0 : index
    %253 = vector.load %arg9[%c15_162, %c0_163, %c0_164] : memref<16x16x128xf32, #tpu.memory_space<vmem>>, vector<1x16x128xf32>
    %254 = vector.shape_cast %253 : vector<1x16x128xf32> to vector<16x128xf32>
    %255 = arith.addf %252, %254 : vector<16x128xf32>
    %c15_165 = arith.constant 15 : index
    %c0_166 = arith.constant 0 : index
    %c0_167 = arith.constant 0 : index
    %256 = vector.load %arg10[%c15_165, %c0_166, %c0_167] : memref<16x16x128xf32, #tpu.memory_space<vmem>>, vector<1x16x128xf32>
    %257 = vector.shape_cast %256 : vector<1x16x128xf32> to vector<16x128xf32>
    %258 = vector.shape_cast %255 : vector<16x128xf32> to vector<1x16x128xf32>
    tpu.vector_store %arg10[%c15_165, %c0_166, %c0_167], %258 {strides = array<i32>} : memref<16x16x128xf32, #tpu.memory_space<vmem>>, vector<1x16x128xf32>,
    %c0_168 = arith.constant 0 : index
    %c0_169 = arith.constant 0 : index
    %c0_170 = arith.constant 0 : index
    %259 = vector.load %arg10[%c0_168, %c0_169, %c0_170] : memref<16x16x128xf32, #tpu.memory_space<vmem>>, vector<16x16x128xf32>
    %260 = vector.extract_strided_slice %97 {offsets = [0, 0, 16], sizes = [1, 16, 16], strides = [1, 1, 1]} : vector<2x16x32xf32> to vector<1x16x16xf32>
    %261 = vector.shape_cast %260 : vector<1x16x16xf32> to vector<16x16xf32>
    %262 = vector.shape_cast %261 : vector<16x16xf32> to vector<16x16x1xf32>
    %263 = vector.shape_cast %262 : vector<16x16x1xf32> to vector<16x16x1xf32>
    %264 = vector.broadcast %263 : vector<16x16x1xf32> to vector<16x16x64xf32>
    %265 = vector.extract_strided_slice %97 {offsets = [1, 0, 16], sizes = [1, 16, 16], strides = [1, 1, 1]} : vector<2x16x32xf32> to vector<1x16x16xf32>
    %266 = vector.shape_cast %265 : vector<1x16x16xf32> to vector<16x16xf32>
    %267 = vector.shape_cast %266 : vector<16x16xf32> to vector<16x16x1xf32>
    %268 = vector.shape_cast %267 : vector<16x16x1xf32> to vector<16x16x1xf32>
    %269 = vector.broadcast %268 : vector<16x16x1xf32> to vector<16x16x64xf32>
    %270 = tpu.concatenate %264, %269 in 2 : vector<16x16x64xf32>, vector<16x16x64xf32> -> vector<16x16x128xf32>
    %271 = arith.mulf %259, %270 : vector<16x16x128xf32>
    %cst_171 = arith.constant dense<0.000000e+00> : vector<16x128xf32>
    %272 = vector.multi_reduction <add>, %271, %cst_171 [1] : vector<16x16x128xf32> to vector<16x128xf32>
    %c22 = arith.constant 22 : index
    %c0_172 = arith.constant 0 : index
    %273 = vector.load %arg3[%c22, %c0_172] : memref<23x128xf32, #tpu.memory_space<vmem>>, vector<1x128xf32>
    %274 = vector.broadcast %273 : vector<1x128xf32> to vector<16x128xf32>
    %275 = arith.mulf %274, %62 : vector<16x128xf32>
    %276 = arith.addf %272, %275 : vector<16x128xf32>
    %277 = vector.extract_strided_slice %276 {offsets = [0, 0], sizes = [16, 64], strides = [1, 1]} : vector<16x128xf32> to vector<16x64xf32>
    %278 = vector.extract_strided_slice %276 {offsets = [0, 64], sizes = [16, 64], strides = [1, 1]} : vector<16x128xf32> to vector<16x64xf32>
    %279 = tpu.concatenate %277, %278 in 0 : vector<16x64xf32>, vector<16x64xf32> -> vector<32x64xf32>
    %cst_173 = arith.constant 5.000000e-01 : f32
    %280 = vector.broadcast %cst_173 : f32 to vector<32x64xf32>
    %281 = arith.mulf %280, %20 : vector<32x64xf32>
    %282 = math.tanh %281 : vector<32x64xf32>
    %cst_174 = arith.constant 5.000000e-01 : f32
    %283 = vector.broadcast %cst_174 : f32 to vector<32x64xf32>
    %284 = arith.mulf %283, %282 : vector<32x64xf32>
    %cst_175 = arith.constant 5.000000e-01 : f32
    %285 = vector.broadcast %cst_175 : f32 to vector<32x64xf32>
    %286 = arith.addf %284, %285 : vector<32x64xf32>
    %287 = arith.mulf %20, %286 : vector<32x64xf32>
    %288 = arith.mulf %279, %287 : vector<32x64xf32>
    %c0_176 = arith.constant 0 : index
    %c0_177 = arith.constant 0 : index
    %289 = vector.load %arg6[%c0_176, %c0_177] : memref<64x32xf32, #tpu.memory_space<vmem>>, vector<64x32xf32>
    %cst_178 = arith.constant dense<0.000000e+00> : vector<32x32xf32>
    %290 = tpu.matmul %288, %289, %cst_178 {dimension_numbers = #tpu.dot_dimension_numbers<[1], [0], [0], [1], [0, 0, 1, 1], [], []>} : vector<32x64xf32>, vector<64x32xf32>, vector<32x32xf32> -> vector<32x32xf32>
    %291 = arith.addf %0, %290 : vector<32x32xf32>
    %c0_179 = arith.constant 0 : index
    %c0_180 = arith.constant 0 : index
    %292 = vector.load %arg7[%c0_179, %c0_180] : memref<32x32xf32, #tpu.memory_space<vmem>>, vector<32x32xf32>
    tpu.vector_store %arg7[%c0_179, %c0_180], %291 {strides = array<i32>} : memref<32x32xf32, #tpu.memory_space<vmem>>, vector<32x32xf32>,
    return
  }
  func.func @transform_0(%arg0: i32) -> (i32, i32) {
    %c0_i32 = arith.constant 0 : i32
    %c0_i32_0 = arith.constant 0 : i32
    %c0_i32_1 = arith.constant 0 : i32
    return %c0_i32, %c0_i32_0 : i32, i32
  }
  func.func @transform_1(%arg0: i32) -> (i32, i32) {
    %c0_i32 = arith.constant 0 : i32
    %c0_i32_0 = arith.constant 0 : i32
    %c0_i32_1 = arith.constant 0 : i32
    return %c0_i32, %c0_i32_0 : i32, i32
  }
  func.func @transform_2(%arg0: i32) -> (i32, i32) {
    %c0_i32 = arith.constant 0 : i32
    %c0_i32_0 = arith.constant 0 : i32
    %c0_i32_1 = arith.constant 0 : i32
    return %c0_i32, %c0_i32_0 : i32, i32
  }
  func.func @transform_3(%arg0: i32) -> (i32, i32) {
    %c0_i32 = arith.constant 0 : i32
    %c0_i32_0 = arith.constant 0 : i32
    %c0_i32_1 = arith.constant 0 : i32
    return %c0_i32, %c0_i32_0 : i32, i32
  }
  func.func @transform_4(%arg0: i32) -> (i32, i32) {
    %c0_i32 = arith.constant 0 : i32
    %c0_i32_0 = arith.constant 0 : i32
    %c0_i32_1 = arith.constant 0 : i32
    return %c0_i32, %c0_i32_0 : i32, i32
  }
  func.func @transform_5(%arg0: i32) -> (i32, i32) {
    %c0_i32 = arith.constant 0 : i32
    %c0_i32_0 = arith.constant 0 : i32
    %c0_i32_1 = arith.constant 0 : i32
    return %c0_i32, %c0_i32_0 : i32, i32
  }
  func.func @transform_6(%arg0: i32) -> (i32, i32) {
    %c0_i32 = arith.constant 0 : i32
    %c0_i32_0 = arith.constant 0 : i32
    %c0_i32_1 = arith.constant 0 : i32
    return %c0_i32, %c0_i32_0 : i32, i32
  }
}

</mosaic_0001>

<bundles_post_ra>
// kernel: tpu_custom_call.1
= control target key start
LH: loop header
LB: loop body
LE: loop exit
PB: predicated region body
PF: predicated region fallthrough
CT: control target
= control target key end

     0   :  { %vm32_vm0 = vcmask 261120   ;;  %s3601_s0 = inlined_call_operand.vmem [shape: f32[32,32], index: 0, kind: input, shape index: {}]   ;;  %s3602_s1 = inlined_call_operand.vmem [shape: f32[32,128], index: 1, kind: input, shape index: {}]   ;;  %s3603_s2 = inlined_call_operand.vmem [shape: f32[23,128], index: 2, kind: input, shape index: {}]   ;;  %s3604_s3 = inlined_call_operand.vmem [shape: f32[64,64], index: 3, kind: input, shape index: {}]   ;;  %s3605_s4 = inlined_call_operand.vmem [shape: f32[64,32], index: 4, kind: input, shape index: {}]   ;;  %s3606_s5 = inlined_call_operand.vmem [shape: f32[64,32], index: 5, kind: input, shape index: {}]   ;;  %s3607_s6 = inlined_call_operand.hbm [shape: f32[32,32], index: 6, kind: output, shape index: {}]  }
   0x1   :  { %v2378_v0 = vld [vmem:[%s3601_s0] sm:$0xff]  ;;  %v2383_v1 = vld [vmem:[%s3601_s0 + $0x10] sm:$0xff]  ;;  %v2388_v2 = vld [vmem:[%s3601_s0 + $0x8] sm:$0xff] }
   0x2   :  { %v28_v3 = vmul.f32 %v2378_v0, %v2378_v0  ;;  %v30_v4 = vmul.f32 %v2383_v1, %v2383_v1  ;;  %v2397_v5 = vld [vmem:[%s3601_s0 + $0x18] sm:$0xff] }
   0x4   :  { %v33_v6 = vsel %vm32_vm0, %v28_v3, 0.0  ;;  %v39_v7 = vsel %vm32_vm0, %v30_v4, 0.0 }
   0x5   :  { %34 = vadd.xlane.f32.xlu0 %v33_v6  ;;  %40 = vadd.xlane.f32.xlu1 %v39_v7 }
   0x6   :  { %11 = vsyncpa [#allocation6], 0  ;;  %v29_v8 = vmul.f32 %v2388_v2, %v2388_v2  ;;  %v31_v9 = vmul.f32 %v2397_v5, %v2397_v5  ;;  %v2335_v12 = vmov 32.0   ;;  %v107_v15 = vld [vmem:[%s3602_s1 + $0x18] sm:$0xff]  ;;  %v106_v17 = vld [vmem:[%s3602_s1 + $0x10] sm:$0xff]  ;;  %vm157_vm14 = vcmask 523264  }
   0x7   :  { %2211 = vrcp.f32 %v2335_v12  ;;  %132 = vmatpush.msra.mxu0 %v107_v15  ;;  %v105_v18 = vld [vmem:[%s3602_s1 + $0x8] sm:$0xff]  ;;  %v104_v20 = vld [vmem:[%s3602_s1] sm:$0xff]  ;;  %s2336_s1 = smov 64   ;;  %v280_v12 = vld [vmem:[%s3604_s3 + $0x30] sm:$0xff]  ;;  %s2337_s30 = smov [#allocation5]  }
   0x8   :  { %v36_v10 = vsel %vm32_vm0, %v29_v8, 0.0  ;;  %v42_v11 = vsel %vm32_vm0, %v31_v9, 0.0  ;;  %v168_v8 = vlaneseq  ;;  %v233_v15 = vld [vmem:[%s3605_s4 + $0x20] sm:$0xff]  ;;  %s2092_s7 = sshll.u32 %s2337_s30, 4  ;;  %s2094_s10 = sshll.u32 %s3607_s6, 4  ;;  %s2093_s7 = int_to_ptr.vmem [resolvable:$true] %s2092_s7  ;;  %s2095_s10 = int_to_ptr.hbm [resolvable:$true] %s2094_s10 }
   0x9   :  { %133 = vmatpush.msra.mxu0 %v106_v17  ;;  %v232_v17 = vld [vmem:[%s3605_s4 + $0x18] sm:$0xff]  ;;  %s2339_s13 = smov 8  }
   0xa   :  { %v2439_v9 = vshrl.u32 %v168_v8, 7 }
   0xb   :  { %134 = vmatpush.msra.mxu0 %v105_v18  ;;  %v277_v18 = vld [vmem:[%s3604_s3 + $0x18] sm:$0xff] }
   0xc   :  { %2127 = vset.pattern.permute.xlu2 %v2439_v9  ;;  %vm173_vm15 = vcmp.lt.s32.totalorder %v2439_v9, 3 }
   0xd   :  { %37 = vadd.xlane.f32.xlu0 %v36_v10  ;;  %43 = vadd.xlane.f32.xlu1 %v42_v11  ;;  %v2212_v13 = vpop.eup %2211  ;;  %v281_v10 = vld [vmem:[%s3604_s3 + $0x38] sm:$0xff]  ;;  %v235_v11 = vld [vmem:[%s3605_s4 + $0x30] sm:$0xff] }
   0xe   :  { %v46_v14 = vmul.f32 32.0, %v2212_v13  ;;  %135 = vmatpush.msra.mxu0 %v104_v20  ;;  %vm50_vm1 = vweird.f32 %v2212_v13  ;;  %290 = vmatpush.msra.mxu2 %v281_v10  ;;  %v276_v20 = vld [vmem:[%s3604_s3 + $0x10] sm:$0xff] }
  0x10   :  { %v47_v16 = vsub.f32 1.0, %v46_v14  ;;  %v279_v14 = vld [vmem:[%s3604_s3 + $0x28] sm:$0xff]  ;;  %291 = vmatpush.msra.mxu2 %v280_v12 }
  0x12   :  { %v48_v19 = vmul.f32 %v2212_v13, %v47_v16  ;;  %v278_v16 = vld [vmem:[%s3604_s3 + $0x20] sm:$0xff]  ;;  %292 = vmatpush.msra.mxu2 %v279_v14 }
  0x14   :  { %v49_v21 = vadd.f32 %v2212_v13, %v48_v19  ;;  %293 = vmatpush.msra.mxu2 %v278_v16  ;;  %v231_v19 = vld [vmem:[%s3605_s4 + $0x10] sm:$0xff]  ;;  %v2547_v16 = vadd.s32 8, %v2439_v9 }
  0x16   :  { %v51_v22 = vsel %vm50_vm1, %v2212_v13, %v49_v21  ;;  %v234_v13 = vld [vmem:[%s3605_s4 + $0x28] sm:$0xff]  ;;  %294 = vmatpush.msra.mxu2 %v277_v18  ;;  %vm187_vm1 = vcmp.lt.s32.totalorder %v2439_v9, 2  ;;  %2129 = vset.pattern.permute.xlu1 %v2547_v16 }
  0x17   :  { %2128 = vset.pattern.permute.xlu0 %v2547_v16 }
  0x18   :  { %295 = vmatpush.msra.mxu2 %v276_v20 }
  0x78   :  { %v35_v23 = vpop.xlane.xlu0 %34  ;;  %v41_v24 = vpop.xlane.xlu1 %40 }
  0x79   :  { %v52_v25 = vmul.f32 %v51_v22, %v35_v23  ;;  %v54_v26 = vmul.f32 %v51_v22, %v41_v24  ;;  %v275_v23 = vld [vmem:[%s3604_s3 + $0x8] sm:$0xff]  ;;  %v229_v24 = vld [vmem:[%s3605_s4] sm:$0xff] }
  0x7a   :  { %296 = vmatpush.msra.mxu2 %v275_v23 }
  0x7b   :  { %v56_v27 = vadd.f32 1e-05, %v52_v25  ;;  %v58_v28 = vadd.f32 1e-05, %v54_v26  ;;  %v274_v25 = vld [vmem:[%s3604_s3] sm:$0xff] }
  0x7c   :  { %v2204_v26 = vld [vmem:[%s3603_s2 + $0x13] ss:$0 sm:$0xff]  ;;  %297 = vmatpush.msra.mxu2 %v274_v25 }
  0x7d   :  { %2213 = vrsqrt.f32 %v56_v27  ;;  %vm66_vm3 = vweird.f32 %v56_v27  ;;  %vm86_vm8 = vweird.f32 %v58_v28 }
  0x7e   :  { %2215 = vrsqrt.f32 %v58_v28 }
  0x80   :  { %v38_v29 = vpop.xlane.xlu0 %37  ;;  %v44_v30 = vpop.xlane.xlu1 %43 }
  0x81   :  { %v53_v31 = vmul.f32 %v51_v22, %v38_v29  ;;  %v55_v32 = vmul.f32 %v51_v22, %v44_v30  ;;  %v230_v22 = vld [vmem:[%s3605_s4 + $0x8] sm:$0xff]  ;;  %v2205_v29 = vld [vmem:[%s3603_s2 + $0x14] ss:$0 sm:$0xff] }
  0x83   :  { %v2214_v33 = vpop.eup %2213  ;;  %v57_v34 = vadd.f32 1e-05, %v53_v31  ;;  %v59_v35 = vadd.f32 1e-05, %v55_v32 }
  0x84   :  { %v61_v36 = vmul.f32 %v2214_v33, %v56_v27  ;;  %v2216_v37 = vpop.eup %2215  ;;  %vm67_vm2 = vweird.f32 %v2214_v33 }
  0x85   :  { %2217 = vrsqrt.f32 %v57_v34  ;;  %v81_v40 = vmul.f32 %v2216_v37, %v58_v28  ;;  %vm68_vm4 = vmor %vm66_vm3, %vm67_vm2  ;;  %vm76_vm6 = vweird.f32 %v57_v34  ;;  %vm87_vm9 = vweird.f32 %v2216_v37 }
  0x86   :  { %v62_v38 = vmul.f32 %v2214_v33, %v61_v36  ;;  %2219 = vrsqrt.f32 %v59_v35  ;;  %vm88_vm10 = vmor %vm86_vm8, %vm87_vm9  ;;  %vm96_vm11 = vweird.f32 %v59_v35  ;;  %vm201_vm2 = vcmp.lt.s32.totalorder %v2439_v9, 1 }
  0x87   :  { %v82_v43 = vmul.f32 %v2216_v37, %v81_v40  ;;  %v2207_v40 = vld [vmem:[%s3603_s2 + $0x11] ss:$0 sm:$0xff]  ;;  %vm1949_vm3 = vcmask 1041409   ;;  %vm1964_vm8 = vcmask 1046534   ;;  %vm1967_vm9 = vcmask 1047559  }
  0x88   :  { %v63_v39 = vmul.f32 0.5, %v62_v38 }
  0x89   :  { %v83_v50 = vmul.f32 0.5, %v82_v43 }
  0x8a   :  { %v64_v41 = vsub.f32 1.5, %v63_v39 }
  0x8b   :  { %v2218_v42 = vpop.eup %2217  ;;  %v84_v54 = vsub.f32 1.5, %v83_v50 }
  0x8c   :  { %v71_v44 = vmul.f32 %v2218_v42, %v57_v34  ;;  %v65_v45 = vmul.f32 %v2214_v33, %v64_v41  ;;  %v2220_v46 = vpop.eup %2219  ;;  %vm77_vm5 = vweird.f32 %v2218_v42 }
  0x8d   :  { %v91_v52 = vmul.f32 %v2220_v46, %v59_v35  ;;  %vm78_vm7 = vmor %vm76_vm6, %vm77_vm5  ;;  %v85_v60 = vmul.f32 %v2216_v37, %v84_v54  ;;  %vm97_vm12 = vweird.f32 %v2220_v46  ;;  %vm1955_vm5 = vcmask 1043459  }
  0x8e   :  { %v72_v47 = vmul.f32 %v2218_v42, %v71_v44  ;;  %v69_v48 = vsel %vm68_vm4, %v2214_v33, %v65_v45  ;;  %vm98_vm13 = vmor %vm96_vm11, %vm97_vm12  ;;  %v2206_v33 = vld [vmem:[%s3603_s2 + $0x10] ss:$0 sm:$0xff]  ;;  %vm1952_vm4 = vcmask 1042434   ;;  %vm1958_vm6 = vcmask 1044484  }
  0x8f   :  { %v100_v49 = vmul.f32 %v69_v48, %v2378_v0  ;;  %v92_v55 = vmul.f32 %v2220_v46, %v91_v52  ;;  %v89_v62 = vsel %vm88_vm10, %v2216_v37, %v85_v60 }
  0x90   :  { %v73_v51 = vmul.f32 0.5, %v72_v47  ;;  %v102_v63 = vmul.f32 %v89_v62, %v2383_v1 }
  0x91   :  { %2106 = vmatmul.msk.f32.vlgmr.msra.gmra.mxu0 %vm32_vm0, %v100_v49  ;;  %v93_v59 = vmul.f32 0.5, %v92_v55 }
  0x92   :  { %v74_v53 = vsub.f32 1.5, %v73_v51 }
  0x93   :  { %v94_v61 = vsub.f32 1.5, %v93_v59 }
  0x94   :  { %v75_v56 = vmul.f32 %v2218_v42, %v74_v53 }
  0x95   :  { %v95_v0 = vmul.f32 %v2220_v46, %v94_v61 }
  0x96   :  { %v79_v57 = vsel %vm78_vm7, %v2218_v42, %v75_v56  ;;  %vm1961_vm7 = vcmask 1045509  }
  0x97   :  { %v101_v58 = vmul.f32 %v79_v57, %v2388_v2  ;;  %v99_v3 = vsel %vm98_vm13, %v2220_v46, %v95_v0  ;;  %v2208_v46 = vld [vmem:[%s3603_s2 + $0x12] ss:$0 sm:$0xff] }
  0x98   :  { %v103_v4 = vmul.f32 %v99_v3, %v2397_v5  ;;  %v236_v5 = vld [vmem:[%s3605_s4 + $0x38] sm:$0xff] }
  0x99   :  { %2107 = vmatmul.msk.f32.gmra.mxu0 %vm32_vm0, %v101_v58  ;;  %253 = vmatpush.msra.mxu1 %v236_v5 }
  0x9b   :  { %254 = vmatpush.msra.mxu1 %v235_v11 }
  0x9d   :  { %255 = vmatpush.msra.mxu1 %v234_v13 }
  0x9f   :  { %256 = vmatpush.msra.mxu1 %v233_v15 }
  0xa1   :  { %2108 = vmatmul.msk.f32.gmra.mxu0 %vm32_vm0, %v102_v63  ;;  %257 = vmatpush.msra.mxu1 %v232_v17 }
  0xa3   :  { %258 = vmatpush.msra.mxu1 %v231_v19 }
  0xa5   :  { %259 = vmatpush.msra.mxu1 %v230_v22 }
  0xa7   :  { %260 = vmatpush.msra.mxu1 %v229_v24 }
  0xa9   :  { %2109 = vmatmul.msk.f32.gmra.mxu0 %vm32_vm0, %v103_v4 }
 0x10e   :  { %v2427_v2 = vpop.f32.mrf.mxu0 }
 0x10f   :  { %3630 = vst [vmem:[#allocation8_spill] sm:$0xff] %v2427_v2 }
 0x116   :  { %v2429_v6 = vpop.f32.mrf.mxu0 }
 0x117   :  { %3631 = vst [vmem:[#allocation9_spill] sm:$0xff] %v2429_v6 }
 0x11e   :  { %v2431_v7 = vpop.f32.mrf.mxu0 }
 0x11f   :  { %151 = vrot.lane.b32.xlu2 %v2431_v7, %s2336_s1 }
 0x126   :  { %v2435_v1 = vpop.f32.mrf.mxu0 }
 0x127   :  { %3632 = vst [vmem:[#allocation10_spill] sm:$0xff] %v2435_v1  ;;  %153 = vrot.lane.b32.xlu2 %v2435_v1, %s2336_s1 }
 0x179   :  { %v152_v21 = vpop.permute.xlu2 %151 }
 0x17a   :  { %v158_v27 = vsel %vm157_vm14, %v2427_v2, %v152_v21 }
 0x17b   :  { %v163_v30 = vmul.f32 %v2204_v26, %v158_v27  ;;  %v171_v31 = vrot.slane %v158_v27, 5  ;;  %v185_v32 = vrot.slane %v158_v27, 6  ;;  %v199_v39 = vrot.slane %v158_v27, 7 }
 0x17d   :  { %v166_v45 = vadd.f32 %v2205_v29, %v163_v30 }
 0x181   :  { %v154_v28 = vpop.permute.xlu2 %153 }
 0x182   :  { %v159_v34 = vsel %vm157_vm14, %v2429_v6, %v154_v28 }
 0x183   :  { %v164_v35 = vmul.f32 %v2204_v26, %v159_v34  ;;  %v172_v36 = vrot.slane %v159_v34, 5  ;;  %v186_v37 = vrot.slane %v159_v34, 6  ;;  %v200_v38 = vrot.slane %v159_v34, 7 }
 0x184   :  { %v2564_v26 = vadd.s32 24, %v2439_v9 }
 0x185   :  { %v167_v41 = vadd.f32 %v2205_v29, %v164_v35  ;;  %v174_v42 = vsel %vm173_vm15, %v171_v31, %v172_v36  ;;  %v175_v43 = vsel %vm173_vm15, %v172_v36, %v171_v31  ;;  %v188_v44 = vsel %vm187_vm1, %v185_v32, %v186_v37 }
 0x186   :  { %v177_v47 = vsel %vm173_vm15, 0.0, %v175_v43  ;;  %v182_v48 = vmul.f32 %v2206_v33, %v174_v42  ;;  %v189_v49 = vsel %vm187_vm1, %v186_v37, %v185_v32  ;;  %v202_v52 = vsel %vm201_vm2, %v199_v39, %v200_v38 }
 0x187   :  { %v181_v50 = vmul.f32 %v2206_v33, %v177_v47  ;;  %v191_v51 = vsel %vm187_vm1, 0.0, %v189_v49  ;;  %v203_v53 = vsel %vm201_vm2, %v200_v38, %v199_v39  ;;  %v196_v55 = vmul.f32 %v2207_v40, %v188_v44 }
 0x188   :  { %v184_v54 = vadd.f32 %v182_v48, %v167_v41  ;;  %v205_v56 = vsel %vm201_vm2, 0.0, %v203_v53  ;;  %v195_v58 = vmul.f32 %v2207_v40, %v191_v51  ;;  %v210_v60 = vmul.f32 %v2208_v46, %v202_v52 }
 0x189   :  { %v183_v57 = vadd.f32 %v181_v50, %v166_v45  ;;  %v209_v62 = vmul.f32 %v2208_v46, %v205_v56  ;;  %v2582_v31 = vadd.s32 16, %v2439_v9 }
 0x18a   :  { %v198_v59 = vadd.f32 %v196_v55, %v184_v54 }
 0x18b   :  { %v197_v61 = vadd.f32 %v195_v58, %v183_v57 }
 0x18c   :  { %v212_v63 = vadd.f32 %v210_v60, %v198_v59 }
 0x18d   :  { %v211_v0 = vadd.f32 %v209_v62, %v197_v61 }
 0x18e   :  { %v214_v3 = vmul.f32 0.5, %v212_v63 }
 0x18f   :  { %v213_v4 = vmul.f32 0.5, %v211_v0 }
 0x190   :  { %2221 = vtanh.f32 %v214_v3 }
 0x191   :  { %2223 = vtanh.f32 %v213_v4 }
 0x196   :  { %v2222_v8 = vpop.eup %2221 }
 0x197   :  { %v2224_v5 = vpop.eup %2223  ;;  %v218_v10 = vmul.f32 0.5, %v2222_v8 }
 0x198   :  { %v217_v11 = vmul.f32 0.5, %v2224_v5 }
 0x199   :  { %v220_v12 = vadd.f32 0.5, %v218_v10 }
 0x19a   :  { %v219_v13 = vadd.f32 0.5, %v217_v11 }
 0x19b   :  { %v2530_v14 = vmul.f32 %v220_v12, %v212_v63 }
 0x19c   :  { %v2532_v15 = vmul.f32 %v219_v13, %v211_v0 }
 0x19d   :  { %3633 = vst [vmem:[#allocation11_spill] sm:$0xff] %v2530_v14  ;;  %227 = vrot.lane.b32.xlu1 %v2530_v14, %s2336_s1 }
 0x19e   :  { %225 = vrot.lane.b32.xlu0 %v2532_v15, %s2336_s1  ;;  %2110 = vmatmul.msk.f32.vlgmr.msra.gmra.mxu1 %vm157_vm14, %v2532_v15 }
 0x19f   :  { %2114 = vmatmul.msk.f32.vlgmr.msra.gmra.mxu2 %vm157_vm14, %v2532_v15 }
 0x1a6   :  { %2111 = vmatmul.msk.f32.gmra.mxu1 %vm157_vm14, %v2530_v14 }
 0x1a7   :  { %2115 = vmatmul.msk.f32.gmra.mxu2 %vm157_vm14, %v2530_v14 }
 0x20f   :  { %v228_v18 = vpop.permute.xlu1 %227 }
 0x210   :  { %v226_v17 = vpop.permute.xlu0 %225 }
 0x211   :  { %2112 = vmatmul.msk.f32.gmra.mxu1 %vm157_vm14, %v226_v17  ;;  %2116 = vmatmul.msk.f32.gmra.mxu2 %vm157_vm14, %v226_v17 }
 0x219   :  { %2113 = vmatmul.msk.f32.gmra.mxu1 %vm157_vm14, %v228_v18  ;;  %2117 = vmatmul.msk.f32.gmra.mxu2 %vm157_vm14, %v228_v18 }
 0x21b   :  { %v262_v19 = vpop.f32.mrf.mxu1 }
 0x21c   :  { %v539_v20 = vperm.slane %v262_v19, 0  ;;  %v2555_v21 = vperm.slane %v262_v19, 1  ;;  %v565_v22 = vperm.slane %v262_v19, 2  ;;  %v578_v23 = vperm.slane %v262_v19, 3 }
 0x21d   :  { %v591_v24 = vperm.slane %v262_v19, 4  ;;  %v604_v25 = vperm.slane %v262_v19, 5  ;;  %v2568_v27 = vperm.slane %v262_v19, 6  ;;  %v630_v28 = vperm.slane %v262_v19, 7 }
 0x21e   :  { %550 = vperm.xlu0 %2128, %v539_v20   ;;  %544 = vperm.xlu2 %2127, %v539_v20  }
 0x21f   :  { %563 = vperm.xlu1 %2129, %v2555_v21  }
 0x223   :  { %v2574_v29 = vpop.f32.mrf.mxu1 }
 0x224   :  { %v2577_v30 = vperm.slane %v2574_v29, 0  ;;  %v2587_v32 = vperm.slane %v2574_v29, 2  ;;  %v2594_v33 = vperm.slane %v2574_v29, 5  ;;  %v2601_v34 = vperm.slane %v2574_v29, 7 }
 0x225   :  { %v656_v37 = vperm.slane %v2574_v29, 1  ;;  %v2633_v40 = vperm.slane %v2574_v29, 3  ;;  %v2638_v41 = vperm.slane %v2574_v29, 4  ;;  %v2655_v45 = vperm.slane %v2574_v29, 6 }
 0x226   :  { %2130 = vset.pattern.permute.xlu0 %v2439_v9  ;;  %557 = vperm.xlu2 %2127, %v2555_v21   ;;  %3634 = vst [vmem:[#allocation12_spill] sm:$0xff] %v2594_v33 }
 0x227   :  { %576 = vperm.xlu1 %2129, %v565_v22   ;;  %3635 = vst [vmem:[#allocation13_spill] sm:$0xff] %v2601_v34 }
 0x228   :  { %3636 = vst [vmem:[#allocation14_spill] sm:$0xff] %v2655_v45 }
 0x22e   :  { %583 = vperm.xlu0 %2130, %v578_v23   ;;  %570 = vperm.xlu2 %2127, %v565_v22  }
 0x22f   :  { %2132 = vset.pattern.permute.xlu1 %v2439_v9 }
 0x236   :  { %2133 = vset.pattern.permute.xlu0 %v2547_v16  ;;  %2131 = vset.pattern.permute.xlu2 %v2547_v16 }
 0x237   :  { %596 = vperm.xlu1 %2132, %v591_v24  }
 0x23e   :  { %615 = vperm.xlu0 %2133, %v604_v25   ;;  %589 = vperm.xlu2 %2131, %v578_v23  }
 0x23f   :  { %609 = vperm.xlu1 %2132, %v604_v25  }
 0x246   :  { %2140 = vset.pattern.permute.xlu0 %v2564_v26  ;;  %602 = vperm.xlu2 %2131, %v591_v24  }
 0x247   :  { %2135 = vset.pattern.permute.xlu1 %v2547_v16 }
 0x24e   :  { %1366 = vperm.xlu0 %2140, %v578_v23   ;;  %2134 = vset.pattern.permute.xlu2 %v2439_v9 }
 0x24f   :  { %628 = vperm.xlu1 %2135, %v2568_v27  }
 0x256   :  { %2145 = vset.pattern.permute.xlu0 %v2439_v9  ;;  %622 = vperm.xlu2 %2134, %v2568_v27  }
 0x257   :  { %641 = vperm.xlu1 %2135, %v630_v28  }
 0x25e   :  { %635 = vperm.xlu2 %2134, %v630_v28   ;;  %648 = vperm.xlu0 %2145, %v2577_v30  }
 0x25f   :  { %2137 = vset.pattern.permute.xlu1 %v2564_v26 }
 0x266   :  { %2136 = vset.pattern.permute.xlu2 %v2582_v31  ;;  %2148 = vset.pattern.permute.xlu0 %v2547_v16 }
 0x267   :  { %1330 = vperm.xlu1 %2137, %v539_v20  }
 0x26e   :  { %1324 = vperm.xlu2 %2136, %v539_v20   ;;  %680 = vperm.xlu0 %2148, %v2587_v32  }
 0x26f   :  { %2139 = vset.pattern.permute.xlu1 %v2582_v31 }
 0x276   :  { %2138 = vset.pattern.permute.xlu2 %v2564_v26  ;;  %2151 = vset.pattern.permute.xlu0 %v2439_v9 }
 0x277   :  { %1348 = vperm.xlu1 %2139, %v565_v22  }
 0x278   :  { %v2643_v42 = vpop.permute.xlu2 %544 }
 0x27e   :  { %1342 = vperm.xlu2 %2138, %v2555_v21   ;;  %713 = vperm.xlu0 %2151, %v2594_v33  }
 0x27f   :  { %1360 = vperm.xlu1 %2139, %v578_v23  }
 0x280   :  { %v2657_v46 = vpop.permute.xlu2 %557 }
 0x286   :  { %1354 = vperm.xlu2 %2138, %v565_v22   ;;  %2154 = vset.pattern.permute.xlu0 %v2547_v16 }
 0x287   :  { %2142 = vset.pattern.permute.xlu1 %v2564_v26 }
 0x288   :  { %v2665_v47 = vpop.permute.xlu2 %570 }
 0x28e   :  { %2141 = vset.pattern.permute.xlu2 %v2582_v31  ;;  %745 = vperm.xlu0 %2154, %v2601_v34   ;;  %v2610_v35 = vpop.f32.mrf.mxu1 }
 0x28f   :  { %1378 = vperm.xlu1 %2142, %v591_v24   ;;  %v2613_v36 = vperm.slane %v2610_v35, 2  ;;  %v2621_v38 = vperm.slane %v2610_v35, 4  ;;  %v2630_v39 = vperm.slane %v2610_v35, 7  ;;  %v2646_v43 = vperm.slane %v2610_v35, 1 }
 0x290   :  { %v2652_v44 = vperm.slane %v2610_v35, 5  ;;  %v2667_v48 = vpop.permute.xlu0 %550  ;;  %v2750_v20 = vperm.slane %v2610_v35, 0 }
 0x291   :  { %v2681_v53 = vpop.permute.xlu1 %563 }
 0x296   :  { %1372 = vperm.xlu2 %2141, %v591_v24   ;;  %2156 = vset.pattern.permute.xlu0 %v2564_v26  ;;  %v2669_v49 = vpop.f32.mrf.mxu1 }
 0x297   :  { %1390 = vperm.xlu1 %2142, %v604_v25   ;;  %v2672_v50 = vperm.slane %v2669_v49, 1  ;;  %v2691_v56 = vperm.slane %v2669_v49, 4  ;;  %v2710_v63 = vperm.slane %v2669_v49, 6  ;;  %v2731_v11 = vperm.slane %v2669_v49, 0 }
 0x298   :  { %v2677_v51 = vpop.permute.xlu2 %589 }
 0x299   :  { %3637 = vst [vmem:[#allocation15_spill] sm:$0xff] %v2691_v56  ;;  %v2696_v57 = vpop.permute.xlu1 %576 }
 0x29a   :  { %3639 = vst [vmem:[#allocation17_spill] sm:$0xff] %v2710_v63 }
 0x29e   :  { %1384 = vperm.xlu2 %2141, %v604_v25   ;;  %1426 = vperm.xlu0 %2156, %v2577_v30  }
 0x29f   :  { %2144 = vset.pattern.permute.xlu1 %v2582_v31 }
 0x2a0   :  { %v2679_v52 = vpop.permute.xlu0 %583  ;;  %v2688_v55 = vpop.permute.xlu2 %602 }
 0x2a6   :  { %2143 = vset.pattern.permute.xlu2 %v2564_v26  ;;  %2163 = vset.pattern.permute.xlu0 %v2439_v9 }
 0x2a7   :  { %1408 = vperm.xlu1 %2144, %v630_v28  }
 0x2a9   :  { %v2703_v60 = vpop.permute.xlu1 %596 }
 0x2ae   :  { %1402 = vperm.xlu2 %2143, %v2568_v27   ;;  %778 = vperm.xlu0 %2163, %v2613_v36  }
 0x2af   :  { %2147 = vset.pattern.permute.xlu1 %v2439_v9 }
 0x2b0   :  { %v2686_v54 = vpop.permute.xlu0 %615  ;;  %v2700_v59 = vpop.permute.xlu2 %622 }
 0x2b1   :  { %v2717_v3 = vpop.permute.xlu1 %609 }
 0x2b6   :  { %1414 = vperm.xlu2 %2143, %v630_v28   ;;  %2166 = vset.pattern.permute.xlu0 %v2547_v16 }
 0x2b7   :  { %661 = vperm.xlu1 %2147, %v656_v37  }
 0x2b8   :  { %v2707_v62 = vpop.permute.xlu2 %635 }
 0x2be   :  { %2146 = vset.pattern.permute.xlu2 %v2547_v16  ;;  %810 = vperm.xlu0 %2166, %v2621_v38  }
 0x2bf   :  { %674 = vperm.xlu1 %2147, %v2587_v32  }
 0x2c0   :  { %v2698_v58 = vpop.permute.xlu0 %1366 }
 0x2c1   :  { %v2726_v5 = vpop.permute.xlu1 %628 }
 0x2c6   :  { %654 = vperm.xlu2 %2146, %v2577_v30   ;;  %2169 = vset.pattern.permute.xlu0 %v2439_v9 }
 0x2c7   :  { %2150 = vset.pattern.permute.xlu1 %v2547_v16 }
 0x2c8   :  { %v2719_v4 = vpop.permute.xlu2 %1324 }
 0x2c9   :  { %v2738_v13 = vpop.permute.xlu1 %641 }
 0x2ce   :  { %667 = vperm.xlu2 %2146, %v656_v37   ;;  %843 = vperm.xlu0 %2169, %v2630_v39  }
 0x2cf   :  { %693 = vperm.xlu1 %2150, %v2633_v40  }
 0x2d0   :  { %v2705_v61 = vpop.permute.xlu0 %648 }
 0x2d1   :  { %3638 = vst [vmem:[#allocation16_spill] sm:$0xff] %v2705_v61 }
 0x2d6   :  { %2149 = vset.pattern.permute.xlu2 %v2439_v9  ;;  %2172 = vset.pattern.permute.xlu0 %v2564_v26 }
 0x2d7   :  { %706 = vperm.xlu1 %2150, %v2638_v41  }
 0x2d8   :  { %v2728_v10 = vpop.permute.xlu2 %1342 }
 0x2d9   :  { %v2747_v19 = vpop.permute.xlu1 %1330 }
 0x2de   :  { %687 = vperm.xlu2 %2149, %v2633_v40   ;;  %1534 = vperm.xlu0 %2172, %v2646_v43  }
 0x2df   :  { %2153 = vset.pattern.permute.xlu1 %v2439_v9 }
 0x2e0   :  { %v2715_v0 = vpop.permute.xlu0 %680  ;;  %v2740_v17 = vpop.permute.xlu2 %1354 }
 0x2e1   :  { %3640 = vst [vmem:[#allocation18_spill] sm:$0xff] %v2715_v0 }
 0x2e6   :  { %700 = vperm.xlu2 %2149, %v2638_v41   ;;  %1582 = vperm.xlu0 %2172, %v2652_v44  }
 0x2e7   :  { %726 = vperm.xlu1 %2153, %v2655_v45  }
 0x2e9   :  { %v2759_v24 = vpop.permute.xlu1 %1348 }
 0x2ee   :  { %2152 = vset.pattern.permute.xlu2 %v2547_v16  ;;  %2181 = vset.pattern.permute.xlu0 %v2547_v16 }
 0x2ef   :  { %739 = vperm.xlu1 %2153, %v2601_v34   ;;  %v2810_v34 = vperm.slane %v2669_v49, 7 }
 0x2f0   :  { %v2724_v8 = vpop.permute.xlu0 %713  ;;  %v2752_v22 = vpop.permute.xlu2 %1372 }
 0x2f1   :  { %3641 = vst [vmem:[#allocation19_spill] sm:$0xff] %v2724_v8  ;;  %v2768_v29 = vpop.permute.xlu1 %1360 }
 0x2f2   :  { %3644 = vst [vmem:[#allocation22_spill] sm:$0xff] %v2752_v22 }
 0x2f3   :  { %3653 = vst [vmem:[#allocation31_spill] sm:$0xff] %v2810_v34 }
 0x2f6   :  { %719 = vperm.xlu2 %2152, %v2594_v33   ;;  %875 = vperm.xlu0 %2181, %v2672_v50  }
 0x2f7   :  { %2155 = vset.pattern.permute.xlu1 %v2582_v31 }
 0x2f8   :  { %v2764_v25 = vpop.permute.xlu2 %1384 }
 0x2f9   :  { %3645 = vst [vmem:[#allocation23_spill] sm:$0xff] %v2764_v25 }
 0x2fe   :  { %732 = vperm.xlu2 %2152, %v2655_v45   ;;  %2184 = vset.pattern.permute.xlu0 %v2439_v9 }
 0x2ff   :  { %1420 = vperm.xlu1 %2155, %v2577_v30  }
 0x300   :  { %v2736_v12 = vpop.permute.xlu0 %745 }
 0x301   :  { %3642 = vst [vmem:[#allocation20_spill] sm:$0xff] %v2736_v12 }
 0x306   :  { %2157 = vset.pattern.permute.xlu2 %v2582_v31  ;;  %908 = vperm.xlu0 %2184, %v2691_v56  }
 0x307   :  { %2158 = vset.pattern.permute.xlu1 %v2564_v26 }
 0x308   :  { %v2773_v30 = vpop.permute.xlu2 %1402 }
 0x309   :  { %3646 = vst [vmem:[#allocation24_spill] sm:$0xff] %v2773_v30 }
 0x30e   :  { %1432 = vperm.xlu2 %2157, %v656_v37   ;;  %2187 = vset.pattern.permute.xlu0 %v2547_v16 }
 0x30f   :  { %1438 = vperm.xlu1 %2158, %v656_v37   ;;  %v2780_v37 = vpop.permute.xlu1 %1378 }
 0x310   :  { %v2745_v18 = vpop.permute.xlu0 %1426  ;;  %3647 = vst [vmem:[#allocation25_spill] sm:$0xff] %v2780_v37 }
 0x311   :  { %3643 = vst [vmem:[#allocation21_spill] sm:$0xff] %v2745_v18 }
 0x316   :  { %1444 = vperm.xlu2 %2157, %v2587_v32   ;;  %940 = vperm.xlu0 %2187, %v2710_v63  }
 0x317   :  { %1450 = vperm.xlu1 %2158, %v2587_v32   ;;  %v1391_v12 = vpop.permute.xlu1 %1390 }
 0x31e   :  { %2159 = vset.pattern.permute.xlu2 %v2564_v26  ;;  %2194 = vset.pattern.permute.xlu0 %v2564_v26 }
 0x31f   :  { %2160 = vset.pattern.permute.xlu1 %v2582_v31 }
 0x320   :  { %v2757_v23 = vpop.permute.xlu0 %778 }
 0x326   :  { %1462 = vperm.xlu2 %2159, %v2633_v40   ;;  %1618 = vperm.xlu0 %2194, %v2731_v11  }
 0x327   :  { %1468 = vperm.xlu1 %2160, %v2638_v41  }
 0x32e   :  { %1474 = vperm.xlu2 %2159, %v2638_v41   ;;  %1498 = vperm.xlu0 %2194, %v2655_v45  }
 0x32f   :  { %2162 = vset.pattern.permute.xlu1 %v2547_v16 }
 0x330   :  { %v2766_v28 = vpop.permute.xlu0 %810 }
 0x336   :  { %2161 = vset.pattern.permute.xlu2 %v2439_v9  ;;  %2199 = vset.pattern.permute.xlu0 %v2582_v31 }
 0x337   :  { %758 = vperm.xlu1 %2162, %v2750_v20  }
 0x33e   :  { %752 = vperm.xlu2 %2161, %v2750_v20   ;;  %1336 = vperm.xlu0 %2199, %v2555_v21   ;;  %v2778_v21 = vperm.slane %v2610_v35, 3 }
 0x33f   :  { %771 = vperm.xlu1 %2162, %v2646_v43  }
 0x340   :  { %v2775_v32 = vpop.permute.xlu0 %843 }
 0x346   :  { %765 = vperm.xlu2 %2161, %v2646_v43   ;;  %1396 = vperm.xlu0 %2199, %v2568_v27   ;;  %v2787_v27 = vpop.permute.xlu2 %1414 }
 0x347   :  { %2165 = vset.pattern.permute.xlu1 %v2439_v9  ;;  %3648 = vst [vmem:[#allocation26_spill] sm:$0xff] %v2787_v27 }
 0x34e   :  { %2164 = vset.pattern.permute.xlu2 %v2547_v16  ;;  %1456 = vperm.xlu0 %2199, %v2633_v40   ;;  %v2795_v61 = vpop.permute.xlu2 %654  ;;  %v1993_v40 = vmul.f32 0.5, %v2431_v7 }
 0x34f   :  { %791 = vperm.xlu1 %2165, %v2778_v21   ;;  %3650 = vst [vmem:[#allocation28_spill] sm:$0xff] %v2795_v61 }
 0x350   :  { %v2785_v41 = vpop.permute.xlu0 %1534  ;;  %2225 = vtanh.f32 %v1993_v40  ;;  %v825_v40 = vperm.slane %v2610_v35, 6 }
 0x356   :  { %784 = vperm.xlu2 %2164, %v2613_v36   ;;  %1552 = vperm.xlu0 %2199, %v2778_v21   ;;  %v668_v27 = vpop.permute.xlu2 %667 }
 0x357   :  { %804 = vperm.xlu1 %2165, %v2621_v38  }
 0x358   :  { %v1583_v8 = vpop.permute.xlu0 %1582 }
 0x359   :  { %v2793_v0 = vsel %vm157_vm14, %v1391_v12, %v1583_v8  ;;  %v2226_v12 = vpop.eup %2225 }
 0x35a   :  { %3649 = vst [vmem:[#allocation27_spill] sm:$0xff] %v2793_v0  ;;  %v2001_v18 = vmul.f32 0.5, %v2226_v12 }
 0x35c   :  { %v2005_v1 = vadd.f32 0.5, %v2001_v18 }
 0x35e   :  { %797 = vperm.xlu2 %2164, %v2778_v21   ;;  %1624 = vperm.xlu0 %2199, %v2672_v50   ;;  %v2807_v14 = vpop.permute.xlu2 %687  ;;  %v2009_v6 = vmul.f32 %v2005_v1, %v2431_v7 }
 0x35f   :  { %2168 = vset.pattern.permute.xlu1 %v2547_v16  ;;  %3652 = vst [vmem:[#allocation30_spill] sm:$0xff] %v2807_v14 }
 0x366   :  { %2167 = vset.pattern.permute.xlu2 %v2439_v9  ;;  %1480 = vperm.xlu0 %2199, %v2594_v33   ;;  %v701_v0 = vpop.permute.xlu2 %700 }
 0x367   :  { %823 = vperm.xlu1 %2168, %v2652_v44  }
 0x368   :  { %v876_v8 = vpop.permute.xlu0 %875 }
 0x369   :  { %v2805_v61 = vsel %vm157_vm14, %v668_v27, %v876_v8 }
 0x36a   :  { %3651 = vst [vmem:[#allocation29_spill] sm:$0xff] %v2805_v61 }
 0x36e   :  { %817 = vperm.xlu2 %2167, %v2652_v44   ;;  %1696 = vperm.xlu0 %2199, %v2810_v34   ;;  %v2822_v35 = vpop.permute.xlu2 %719 }
 0x36f   :  { %836 = vperm.xlu1 %2168, %v825_v40   ;;  %3655 = vst [vmem:[#allocation33_spill] sm:$0xff] %v2822_v35 }
 0x376   :  { %830 = vperm.xlu2 %2167, %v825_v40   ;;  %2019 = vrot.lane.b32.xlu0 %v2009_v6, %s2336_s1  ;;  %v733_v7 = vpop.permute.xlu2 %732 }
 0x377   :  { %2171 = vset.pattern.permute.xlu1 %v2582_v31  ;;  %2203 = vset.pattern.permute.xlu0 %v2564_v26 }
 0x378   :  { %v909_v27 = vpop.permute.xlu0 %908 }
 0x379   :  { %v2820_v8 = vsel %vm157_vm14, %v701_v0, %v909_v27  ;;  %v2833_v0 = vpop.permute.xlu1 %1408 }
 0x37a   :  { %3654 = vst [vmem:[#allocation32_spill] sm:$0xff] %v2820_v8 }
 0x37b   :  { %3657 = vst [vmem:[#allocation35_spill] sm:$0xff] %v2833_v0 }
 0x37e   :  { %2170 = vset.pattern.permute.xlu2 %v2547_v16 }
 0x37f   :  { %1528 = vperm.xlu1 %2171, %v2646_v43   ;;  %v2837_v43 = vpop.permute.xlu2 %1432 }
 0x380   :  { %3658 = vst [vmem:[#allocation36_spill] sm:$0xff] %v2837_v43 }
 0x381   :  { %v2839_v18 = vpop.permute.xlu1 %661 }
 0x382   :  { %3659 = vst [vmem:[#allocation37_spill] sm:$0xff] %v2839_v18  ;;  %v2913_v18 = vperm.slane %v2669_v49, 5 }
 0x384   :  { %3673 = vst [vmem:[#allocation51_spill] sm:$0xff] %v2913_v18 }
 0x386   :  { %849 = vperm.xlu2 %2170, %v2630_v39  }
 0x387   :  { %2174 = vset.pattern.permute.xlu1 %v2564_v26  ;;  %v2843_v12 = vpop.permute.xlu2 %1444 }
 0x388   :  { %v941_v6 = vpop.permute.xlu0 %940  ;;  %3660 = vst [vmem:[#allocation38_spill] sm:$0xff] %v2843_v12 }
 0x389   :  { %v2829_v1 = vsel %vm157_vm14, %v733_v7, %v941_v6  ;;  %v2847_v27 = vpop.permute.xlu1 %674 }
 0x38a   :  { %3656 = vst [vmem:[#allocation34_spill] sm:$0xff] %v2829_v1  ;;  %v2861_v1 = vpop.f32.mrf.mxu2 }
 0x38b   :  { %3661 = vst [vmem:[#allocation39_spill] sm:$0xff] %v2847_v27 }
 0x38e   :  { %2173 = vset.pattern.permute.xlu2 %v2582_v31 }
 0x38f   :  { %1546 = vperm.xlu1 %2174, %v2613_v36   ;;  %v2849_v7 = vpop.permute.xlu2 %1462 }
 0x390   :  { %3662 = vst [vmem:[#allocation40_spill] sm:$0xff] %v2849_v7 }
 0x396   :  { %1540 = vperm.xlu2 %2173, %v2613_v36   ;;  %v2853_v36 = vpop.permute.xlu1 %693 }
 0x397   :  { %1522 = vperm.xlu1 %2174, %v2750_v20   ;;  %3663 = vst [vmem:[#allocation41_spill] sm:$0xff] %v2853_v36  ;;  %v2855_v6 = vpop.permute.xlu2 %1474  ;;  %v2898_v36 = vperm.slane %v2669_v49, 3 }
 0x398   :  { %3664 = vst [vmem:[#allocation42_spill] sm:$0xff] %v2855_v6 }
 0x39e   :  { %1516 = vperm.xlu2 %2173, %v2750_v20   ;;  %v2859_v20 = vpop.permute.xlu1 %706 }
 0x39f   :  { %2176 = vset.pattern.permute.xlu1 %v2582_v31  ;;  %3665 = vst [vmem:[#allocation43_spill] sm:$0xff] %v2859_v20  ;;  %v2863_v12 = vpop.permute.xlu2 %752 }
 0x3a6   :  { %2175 = vset.pattern.permute.xlu2 %v2564_v26 }
 0x3a7   :  { %1564 = vperm.xlu1 %2176, %v2621_v38   ;;  %v2871_v6 = vpop.permute.xlu2 %765 }
 0x3ae   :  { %1558 = vperm.xlu2 %2175, %v2778_v21   ;;  %v2866_v21 = vpop.permute.xlu1 %726 }
 0x3af   :  { %1576 = vperm.xlu1 %2176, %v2652_v44   ;;  %3666 = vst [vmem:[#allocation44_spill] sm:$0xff] %v2866_v21  ;;  %v2868_v44 = vpop.f32.mrf.mxu2 }
 0x3b0   :  { %3667 = vst [vmem:[#allocation45_spill] sm:$0xff] %v2868_v44  ;;  %v2878_v61 = vpop.permute.xlu2 %784  ;;  %v2933_v44 = vpop.permute.xlu0 %1618 }
 0x3b1   :  { %3674 = vst [vmem:[#allocation52_spill] sm:$0xff] %v2933_v44 }
 0x3b6   :  { %1570 = vperm.xlu2 %2175, %v2621_v38   ;;  %v2873_v38 = vpop.permute.xlu1 %739 }
 0x3b7   :  { %2178 = vset.pattern.permute.xlu1 %v2564_v26  ;;  %3668 = vst [vmem:[#allocation46_spill] sm:$0xff] %v2873_v38  ;;  %v305_v7 = vpop.f32.mrf.mxu2 }
 0x3be   :  { %2177 = vset.pattern.permute.xlu2 %v2582_v31  ;;  %v2880_v8 = vpop.permute.xlu1 %1420 }
 0x3bf   :  { %1594 = vperm.xlu1 %2178, %v825_v40   ;;  %3669 = vst [vmem:[#allocation47_spill] sm:$0xff] %v2880_v8 }
 0x3c6   :  { %1588 = vperm.xlu2 %2177, %v825_v40   ;;  %v2884_v40 = vpop.permute.xlu2 %797  ;;  %v2886_v21 = vpop.permute.xlu1 %1438 }
 0x3c7   :  { %2179 = vset.pattern.permute.xlu1 %v2439_v9  ;;  %3670 = vst [vmem:[#allocation48_spill] sm:$0xff] %v2886_v21 }
 0x3ce   :  { %2180 = vset.pattern.permute.xlu2 %v2547_v16  ;;  %v2890_v38 = vpop.permute.xlu2 %817  ;;  %v2893_v0 = vpop.permute.xlu1 %1450 }
 0x3cf   :  { %313 = vrot.lane.b32.xlu2 %v305_v7, %s2336_s1  ;;  %856 = vperm.xlu1 %2179, %v2731_v11   ;;  %v877_v7 = vperm.slane %v2669_v49, 2  ;;  %3671 = vst [vmem:[#allocation49_spill] sm:$0xff] %v2893_v0 }
 0x3d6   :  { %v2895_v8 = vpop.permute.xlu2 %830  ;;  %v2900_v35 = vpop.permute.xlu1 %1468 }
 0x3d7   :  { %862 = vperm.xlu2 %2180, %v2731_v11   ;;  %869 = vperm.xlu1 %2179, %v2672_v50   ;;  %3672 = vst [vmem:[#allocation50_spill] sm:$0xff] %v2900_v35 }
 0x3de   :  { %v2906_v20 = vpop.permute.xlu1 %758 }
 0x3df   :  { %2182 = vset.pattern.permute.xlu2 %v2439_v9  ;;  %2183 = vset.pattern.permute.xlu1 %v2547_v16 }
 0x3e0   :  { %v2904_v21 = vpop.permute.xlu2 %849 }
 0x3e6   :  { %v2917_v35 = vpop.permute.xlu1 %771 }
 0x3e7   :  { %882 = vperm.xlu2 %2182, %v877_v7   ;;  %888 = vperm.xlu1 %2183, %v877_v7  }
 0x3ee   :  { %v2923_v27 = vpop.permute.xlu1 %791 }
 0x3ef   :  { %895 = vperm.xlu2 %2182, %v2898_v36   ;;  %901 = vperm.xlu1 %2183, %v2898_v36  }
 0x3f0   :  { %v2910_v0 = vpop.permute.xlu2 %1540 }
 0x3f6   :  { %v2929_v49 = vpop.permute.xlu1 %804 }
 0x3f7   :  { %2185 = vset.pattern.permute.xlu2 %v2547_v16  ;;  %2186 = vset.pattern.permute.xlu1 %v2439_v9 }
 0x3f8   :  { %v2919_v14 = vpop.permute.xlu2 %1516 }
 0x3fe   :  { %v2937_v33 = vpop.permute.xlu1 %823 }
 0x3ff   :  { %914 = vperm.xlu2 %2185, %v2691_v56   ;;  %921 = vperm.xlu1 %2186, %v2913_v18  }
 0x407   :  { %927 = vperm.xlu2 %2185, %v2913_v18   ;;  %934 = vperm.xlu1 %2186, %v2710_v63   ;;  %v308_v63 = vpop.f32.mrf.mxu2  ;;  %v2946_v18 = vpop.permute.xlu1 %836 }
 0x408   :  { %v2925_v43 = vpop.permute.xlu2 %1558 }
 0x40f   :  { %2188 = vset.pattern.permute.xlu2 %v2439_v9  ;;  %2189 = vset.pattern.permute.xlu1 %v2547_v16  ;;  %v2944_v16 = vpop.permute.xlu0 %1498 }
 0x410   :  { %v2935_v45 = vpop.permute.xlu2 %1570  ;;  %3677 = vst [vmem:[#allocation55_spill] sm:$0xff] %v2944_v16  ;;  %v2960_v16 = vpop.permute.xlu1 %1528 }
 0x411   :  { %3675 = vst [vmem:[#allocation53_spill] sm:$0xff] %v2935_v45 }
 0x417   :  { %947 = vperm.xlu2 %2188, %v2810_v34   ;;  %953 = vperm.xlu1 %2189, %v2810_v34   ;;  %v2952_v34 = vld [vmem:[%s3603_s2 + $0x15] ss:$0 sm:$0xff]  ;;  %v2955_v30 = vpop.permute.xlu0 %1336 }
 0x418   :  { %3678 = vst [vmem:[#allocation56_spill] sm:$0xff] %v2952_v34 }
 0x41f   :  { %2190 = vset.pattern.permute.xlu2 %v2582_v31  ;;  %2191 = vset.pattern.permute.xlu1 %v2564_v26  ;;  %v2964_v37 = vpop.permute.xlu0 %1396 }
 0x420   :  { %315 = vrot.lane.b32.xlu2 %v308_v63, %s2336_s1  ;;  %v2942_v9 = vpop.permute.xlu2 %1588  ;;  %3679 = vst [vmem:[#allocation57_spill] sm:$0xff] %v2964_v37 }
 0x421   :  { %3676 = vst [vmem:[#allocation54_spill] sm:$0xff] %v2942_v9 }
 0x427   :  { %1606 = vperm.xlu1 %2191, %v2630_v39  }
 0x428   :  { %1600 = vperm.xlu2 %2190, %v2630_v39   ;;  %v2966_v39 = vpop.permute.xlu1 %1546 }
 0x429   :  { %v314_v44 = vpop.permute.xlu2 %313 }
 0x42a   :  { %v319_v63 = vsel %vm157_vm14, %v2861_v1, %v314_v44 }
 0x42b   :  { %v323_v56 = vadd.f32 %v2952_v34, %v319_v63  ;;  %v2969_v63 = vpop.permute.xlu0 %1456 }
 0x42c   :  { %3680 = vst [vmem:[#allocation58_spill] sm:$0xff] %v2969_v63 }
 0x42d   :  { %v327_v25 = vand.u32 2147483647, %v323_v56 }
 0x42f   :  { %v329_v9 = vsub.f32 0.0, %v327_v25  ;;  %2193 = vset.pattern.permute.xlu1 %v2582_v31  ;;  %v2976_v25 = vld [vmem:[%s3603_s2 + $0x16] ss:$0 sm:$0xff] }
 0x430   :  { %2192 = vset.pattern.permute.xlu2 %v2564_v26  ;;  %v2971_v34 = vpop.permute.xlu1 %1522  ;;  %3681 = vst [vmem:[#allocation59_spill] sm:$0xff] %v2976_v25 }
 0x431   :  { %v331_v22 = vmul.f32 1.442695, %v329_v9  ;;  %v1991_v9 = vmul.f32 0.5, %v2427_v2  ;;  %v2986_v37 = vpop.permute.xlu2 %862 }
 0x432   :  { %3682 = vst [vmem:[#allocation60_spill] sm:$0xff] %v2986_v37 }
 0x433   :  { %2227 = vpow2.f32 %v331_v22 }
 0x437   :  { %1636 = vperm.xlu1 %2193, %v877_v7  }
 0x438   :  { %1630 = vperm.xlu2 %2192, %v2672_v50   ;;  %v2982_v50 = vmul.f32 %v2976_v25, %v2532_v15  ;;  %v1565_v45 = vpop.permute.xlu1 %1564  ;;  %v2995_v25 = vsel %vm157_vm14, %v2665_v47, %v2757_v23  ;;  %v3017_v47 = vsel %vm157_vm14, %v2728_v10, %v2785_v41  ;;  %v3032_v23 = vld [vmem:[%s3603_s2 + $0x8] sm:$0xff]  ;;  %v3038_v10 = vsel %vm157_vm14, %v2667_v48, %v2906_v20 }
 0x439   :  { %v2228_v1 = vpop.eup %2227  ;;  %3683 = vst [vmem:[#allocation61_spill] sm:$0xff] %v3032_v23  ;;  %v3058_v48 = vsel %vm157_vm14, %v2679_v52, %v2923_v27  ;;  %v3078_v52 = vsel %vm157_vm14, %v2700_v59, %v2895_v8  ;;  %v3100_v27 = vsel %vm157_vm14, %v2726_v5, %v2946_v18 }
 0x43a   :  { %v335_v44 = vadd.f32 1.0, %v2228_v1  ;;  %v325_v1 = vmax.f32 %v323_v56, 0.0  ;;  %v3000_v56 = vsel %vm157_vm14, %v2688_v55, %v2766_v28  ;;  %v3022_v55 = vsel %vm157_vm14, %v2643_v42, %v2863_v12 }
 0x43b   :  { %v3043_v42 = vsel %vm157_vm14, %v2681_v53, %v2917_v35  ;;  %v3063_v53 = vsel %vm157_vm14, %v2717_v3, %v2890_v38 }
 0x43c   :  { %2229 = vlog2.f32 %v335_v44 }
 0x43d   :  { %2231 = vtanh.f32 %v1991_v9  ;;  %v1553_v9 = vpop.permute.xlu0 %1552 }
 0x43e   :  { %v3067_v41 = vsel %vm157_vm14, %v2768_v29, %v1553_v9  ;;  %v3087_v29 = vsel %vm157_vm14, %v2686_v54, %v2937_v33  ;;  %v3105_v33 = vsel %vm157_vm14, %v2759_v24, %v2910_v0  ;;  %v3120_v24 = vsel %vm157_vm14, %v2719_v4, %v2919_v14 }
 0x43f   :  { %1612 = vperm.xlu1 %2193, %v2731_v11   ;;  %v3125_v0 = vsel %vm157_vm14, %v2740_v17, %v2966_v39  ;;  %v3136_v14 = vsel %vm157_vm14, %v2698_v58, %v2925_v43  ;;  %v3686_v17 = vld [vmem:[#allocation53_spill] sm:$0xff] }
 0x440   :  { %1642 = vperm.xlu2 %2192, %v877_v7   ;;  %v1577_v18 = vpop.permute.xlu1 %1576 }
 0x441   :  { %v3095_v8 = vpop.permute.xlu2 %882 }
 0x442   :  { %v2230_v22 = vpop.eup %2229  ;;  %3685 = vst [vmem:[#allocation63_spill] sm:$0xff] %v3095_v8 }
 0x443   :  { %v338_v44 = vmul.f32 0.6931472, %v2230_v22  ;;  %v3005_v22 = vsel %vm157_vm14, %v2707_v62, %v2775_v32  ;;  %v3027_v62 = vsel %vm157_vm14, %v2657_v46, %v2871_v6  ;;  %v3048_v46 = vsel %vm157_vm14, %v2696_v57, %v2878_v61  ;;  %v3082_v35 = vpop.eup %2231 }
 0x444   :  { %v3053_v32 = vsel %vm157_vm14, %v2677_v51, %v2884_v40  ;;  %v3073_v51 = vsel %vm157_vm14, %v2703_v60, %v2929_v49  ;;  %3684 = vst [vmem:[#allocation62_spill] sm:$0xff] %v3082_v35  ;;  %v3092_v60 = vsel %vm157_vm14, %v2738_v13, %v2904_v21  ;;  %v3112_v6 = vsel %vm157_vm14, %v2955_v30, %v2960_v16  ;;  %v3687_v16 = vld [vmem:[#allocation25_spill] sm:$0xff] }
 0x445   :  { %v2984_v63 = vadd.f32 %v338_v44, %v325_v1  ;;  %v3010_v1 = vld [vmem:[%s3603_s2] sm:$0xff]  ;;  %v3131_v40 = vsel %vm157_vm14, %v2747_v19, %v2971_v34  ;;  %v3142_v39 = vsel %vm157_vm14, %v3687_v16, %v3686_v17  ;;  %s2338_s2 = smov 128  }
 0x447   :  { %2196 = vset.pattern.permute.xlu1 %v2564_v26  ;;  %v361_v44 = vperm.slane %v2984_v63, 0  ;;  %v347_v28 = vrot.slane %v2984_v63, 1  ;;  %v348_v61 = vrot.slane %v2984_v63, 2  ;;  %v349_v12 = vrot.slane %v2984_v63, 3 }
 0x448   :  { %2195 = vset.pattern.permute.xlu2 %v2582_v31  ;;  %v350_v54 = vrot.slane %v2984_v63, 4  ;;  %v351_v13 = vrot.slane %v2984_v63, 5  ;;  %v352_v20 = vrot.slane %v2984_v63, 6  ;;  %v353_v21 = vrot.slane %v2984_v63, 7 }
 0x449   :  { %v393_v57 = vmul.f32 %v361_v44, %v3010_v1  ;;  %v394_v3 = vmul.f32 %v361_v44, %v3032_v23  ;;  %v362_v59 = vperm.slane %v347_v28, 0  ;;  %v363_v30 = vperm.slane %v348_v61, 0  ;;  %v3688_v28 = vld [vmem:[#allocation22_spill] sm:$0xff] }
 0x44a   :  { %v364_v4 = vperm.slane %v349_v12, 0  ;;  %v365_v9 = vperm.slane %v350_v54, 0  ;;  %v3147_v34 = vsel %vm157_vm14, %v3688_v28, %v1565_v45  ;;  %v367_v19 = vperm.slane %v352_v20, 0  ;;  %v3690_v12 = vld [vmem:[#allocation57_spill] sm:$0xff]  ;;  %v3174_v28 = vpop.permute.xlu2 %895 }
 0x44b   :  { %v425_v5 = vmul.f32 1.442695, %v393_v57  ;;  %v427_v38 = vmul.f32 1.442695, %v394_v3  ;;  %v395_v49 = vmul.f32 %v362_v59, %v3010_v1  ;;  %v396_v44 = vmul.f32 %v362_v59, %v3032_v23  ;;  %v3689_v3 = vld [vmem:[#allocation54_spill] sm:$0xff]  ;;  %3692 = vst [vmem:[#allocation53_spill] sm:$0xff] %v3174_v28 }
 0x44c   :  { %v3149_v57 = vperm.slane %v353_v21, 0  ;;  %v397_v58 = vmul.f32 %v363_v30, %v3010_v1  ;;  %v398_v43 = vmul.f32 %v363_v30, %v3032_v23  ;;  %v3155_v61 = vmul.f32 %v2984_v63, %v2532_v15 }
 0x44d   :  { %2233 = vpow2.f32 %v425_v5  ;;  %v3160_v59 = vsel %vm157_vm14, %v3690_v12, %v3689_v3  ;;  %v399_v45 = vmul.f32 %v364_v4, %v3010_v1  ;;  %v400_v54 = vmul.f32 %v364_v4, %v3032_v23  ;;  %v3693_v4 = vld [vmem:[#allocation15_spill] sm:$0xff] }
 0x44e   :  { %2235 = vpow2.f32 %v427_v38  ;;  %v401_v20 = vmul.f32 %v365_v9, %v3010_v1  ;;  %v402_v21 = vmul.f32 %v365_v9, %v3032_v23  ;;  %v431_v30 = vmul.f32 1.442695, %v396_v44  ;;  %v3691_v38 = vld [vmem:[#allocation23_spill] sm:$0xff] }
 0x44f   :  { %1654 = vperm.xlu1 %2196, %v2898_v36   ;;  %v3169_v15 = vsel %vm157_vm14, %v3691_v38, %v1577_v18  ;;  %v405_v17 = vmul.f32 %v367_v19, %v3010_v1  ;;  %v406_v16 = vmul.f32 %v367_v19, %v3032_v23  ;;  %v408_v9 = vmul.f32 %v3149_v57, %v3032_v23 }
 0x450   :  { %1648 = vperm.xlu2 %2195, %v2898_v36   ;;  %v366_v36 = vperm.slane %v351_v13, 0  ;;  %v429_v13 = vmul.f32 1.442695, %v395_v49  ;;  %v1595_v49 = vpop.permute.xlu1 %1594  ;;  %v433_v3 = vmul.f32 1.442695, %v397_v58  ;;  %v525_v12 = vrot.slane %v3155_v61, 1 }
 0x451   :  { %v435_v44 = vmul.f32 1.442695, %v398_v43  ;;  %v439_v38 = vmul.f32 1.442695, %v400_v54  ;;  %v987_v19 = vperm.slane %v3155_v61, 0  ;;  %v3694_v43 = vld [vmem:[#allocation24_spill] sm:$0xff] }
 0x452   :  { %v403_v5 = vmul.f32 %v366_v36, %v3010_v1  ;;  %v404_v63 = vmul.f32 %v366_v36, %v3032_v23  ;;  %2237 = vpow2.f32 %v429_v13  ;;  %v437_v36 = vmul.f32 1.442695, %v399_v45 }
 0x453   :  { %v2234_v18 = vpop.eup %2233  ;;  %2239 = vpow2.f32 %v431_v30  ;;  %v441_v7 = vmul.f32 1.442695, %v401_v20  ;;  %v443_v11 = vmul.f32 1.442695, %v402_v21  ;;  %v3182_v37 = vmul.f32 1.442695, %v405_v17 }
 0x454   :  { %v2236_v2 = vpop.eup %2235  ;;  %v445_v28 = vmul.f32 1.442695, %v403_v5  ;;  %v447_v8 = vmul.f32 1.442695, %v404_v63  ;;  %v3184_v58 = vmul.f32 1.442695, %v406_v16  ;;  %v3188_v23 = vsel %vm157_vm14, %v3694_v43, %v1595_v49 }
 0x455   :  { %2241 = vpow2.f32 %v433_v3  ;;  %v526_v45 = vrot.slane %v3155_v61, 2  ;;  %v527_v54 = vrot.slane %v3155_v61, 3  ;;  %v988_v13 = vperm.slane %v525_v12, 0 }
 0x456   :  { %v1019_v30 = vmul.f32 %v987_v19, %v3022_v55  ;;  %v1020_v20 = vmul.f32 %v987_v19, %v3038_v10  ;;  %v1085_v21 = vmul.f32 0.0, %v2234_v18  ;;  %v1086_v5 = vmul.f32 0.0, %v2236_v2 }
 0x457   :  { %1666 = vperm.xlu1 %2196, %v3693_v4   ;;  %2243 = vpow2.f32 %v435_v44  ;;  %v3194_v63 = vmul.f32 1.442695, %v408_v9  ;;  %v528_v17 = vrot.slane %v3155_v61, 4  ;;  %v529_v16 = vrot.slane %v3155_v61, 5 }
 0x458   :  { %1660 = vperm.xlu2 %2195, %v3693_v4   ;;  %v2238_v4 = vpop.eup %2237  ;;  %v530_v49 = vrot.slane %v3155_v61, 6  ;;  %v531_v3 = vrot.slane %v3155_v61, 7  ;;  %v1089_v43 = vadd.f32 %v1085_v21, %v1019_v30  ;;  %v1090_v12 = vadd.f32 %v1086_v5, %v1020_v20 }
 0x459   :  { %v3200_v35 = vpop.permute.xlu2 %914  ;;  %v2240_v55 = vpop.eup %2239  ;;  %2245 = vpow2.f32 %v437_v36  ;;  %v989_v2 = vperm.slane %v526_v45, 0  ;;  %v990_v10 = vperm.slane %v527_v54, 0  ;;  %v1021_v9 = vmul.f32 %v988_v13, %v3027_v62 }
 0x45a   :  { %3695 = vst [vmem:[#allocation25_spill] sm:$0xff] %v3200_v35  ;;  %v1022_v44 = vmul.f32 %v988_v13, %v3043_v42  ;;  %v1096_v18 = vmul.f32 %v2238_v4, %v1089_v43  ;;  %v1097_v19 = vmul.f32 %v2240_v55, %v1090_v12  ;;  %v1737_v61 = vmul.f32 %v3131_v40, %v1090_v12  ;;  %v3208_v35 = vpop.permute.xlu1 %856 }
 0x45b   :  { %v2242_v30 = vpop.eup %2241  ;;  %2247 = vpow2.f32 %v439_v38  ;;  %v991_v20 = vperm.slane %v528_v17, 0  ;;  %v992_v21 = vperm.slane %v529_v16, 0  ;;  %v1736_v5 = vmul.f32 %v3120_v24, %v1089_v43 }
 0x45c   :  { %2249 = vpow2.f32 %v441_v7  ;;  %v993_v36 = vperm.slane %v530_v49, 0  ;;  %v1101_v45 = vadd.f32 %v1096_v18, %v1021_v9  ;;  %v1102_v54 = vadd.f32 %v1097_v19, %v1022_v44  ;;  %v3697_v9 = vld [vmem:[#allocation12_spill] sm:$0xff] }
 0x45d   :  { %v2244_v62 = vpop.eup %2243  ;;  %2251 = vpow2.f32 %v443_v11  ;;  %v1023_v42 = vmul.f32 %v989_v2, %v2995_v25  ;;  %v1024_v13 = vmul.f32 %v989_v2, %v3048_v46  ;;  %v1768_v4 = vadd.f32 %v1737_v61, %v1736_v5  ;;  %v3696_v46 = vld [vmem:[#allocation51_spill] sm:$0xff] }
 0x45e   :  { %v1109_v40 = vmul.f32 %v2242_v30, %v1101_v45  ;;  %v1110_v12 = vmul.f32 %v2244_v62, %v1102_v54  ;;  %v1738_v38 = vmul.f32 %v3112_v6, %v1101_v45  ;;  %v1739_v17 = vmul.f32 %v3017_v47, %v1102_v54 }
 0x45f   :  { %2198 = vset.pattern.permute.xlu1 %v2582_v31  ;;  %v2246_v24 = vpop.eup %2245  ;;  %2253 = vpow2.f32 %v445_v28  ;;  %v3214_v7 = vperm.slane %v531_v3, 0  ;;  %v1025_v16 = vmul.f32 %v990_v10, %v3058_v48  ;;  %v1769_v49 = vrot.slane %v1768_v4, 4 }
 0x460   :  { %2197 = vset.pattern.permute.xlu2 %v2564_v26  ;;  %v1026_v11 = vmul.f32 %v990_v10, %v3053_v32  ;;  %v1114_v43 = vadd.f32 %v1109_v40, %v1023_v42  ;;  %v1115_v25 = vadd.f32 %v1110_v12, %v1024_v13  ;;  %v1775_v55 = vadd.f32 %v1739_v17, %v1738_v38 }
 0x461   :  { %v2248_v2 = vpop.eup %2247  ;;  %2255 = vpow2.f32 %v447_v8  ;;  %v1027_v6 = vmul.f32 %v991_v20, %v3073_v51  ;;  %v1028_v47 = vmul.f32 %v991_v20, %v3000_v56  ;;  %v1770_v28 = vadd.f32 %v1769_v49, %v1768_v4  ;;  %v3224_v10 = vpop.permute.xlu2 %927 }
 0x462   :  { %v2250_v3 = vpop.eup %2249  ;;  %v1122_v44 = vmul.f32 %v2246_v24, %v1114_v43  ;;  %v1123_v48 = vmul.f32 %v2248_v2, %v1115_v25  ;;  %v1740_v18 = vmul.f32 %v3105_v33, %v1114_v43  ;;  %v1741_v32 = vmul.f32 %v3125_v0, %v1115_v25  ;;  %v3234_v4 = vpop.permute.xlu1 %869  ;;  %v3698_v24 = vld [vmem:[#allocation14_spill] sm:$0xff] }
 0x463   :  { %v2252_v19 = vpop.eup %2251  ;;  %v1029_v61 = vmul.f32 %v992_v21, %v3063_v53  ;;  %v407_v51 = vmul.f32 %v3149_v57, %v3010_v1  ;;  %v1771_v8 = vrot.slane %v1770_v28, 2  ;;  %v1776_v56 = vrot.slane %v1775_v55, 4 }
 0x464   :  { %2257 = vpow2.f32 %v3182_v37  ;;  %v1127_v30 = vadd.f32 %v1122_v44, %v1025_v16  ;;  %v1128_v20 = vadd.f32 %v1123_v48, %v1026_v11  ;;  %v1782_v5 = vadd.f32 %v1741_v32, %v1740_v18  ;;  %v3699_v32 = vld [vmem:[#allocation27_spill] sm:$0xff] }
 0x465   :  { %v2254_v45 = vpop.eup %2253  ;;  %v1030_v33 = vmul.f32 %v992_v21, %v3087_v29  ;;  %v1031_v0 = vmul.f32 %v993_v36, %v3078_v52  ;;  %v1772_v54 = vadd.f32 %v1771_v8, %v1770_v28  ;;  %v1777_v62 = vadd.f32 %v1776_v56, %v1775_v55 }
 0x466   :  { %v1135_v42 = vmul.f32 %v2250_v3, %v1127_v30  ;;  %v1136_v13 = vmul.f32 %v2252_v19, %v1128_v20  ;;  %v1742_v53 = vmul.f32 %v3067_v41, %v1127_v30  ;;  %v1743_v57 = vmul.f32 %v3136_v14, %v1128_v20 }
 0x467   :  { %1672 = vperm.xlu1 %2198, %v3696_v46   ;;  %v2256_v40 = vpop.eup %2255  ;;  %2259 = vpow2.f32 %v3184_v58  ;;  %v1783_v37 = vrot.slane %v1782_v5, 4  ;;  %v453_v12 = vmul.f32 1.442695, %v407_v51  ;;  %v1778_v38 = vrot.slane %v1777_v62, 2 }
 0x468   :  { %1486 = vperm.xlu2 %2197, %v3697_v9   ;;  %v1032_v29 = vmul.f32 %v993_v36, %v3100_v27  ;;  %v1140_v21 = vadd.f32 %v1135_v42, %v1027_v6  ;;  %v1141_v52 = vadd.f32 %v1136_v13, %v1028_v47  ;;  %v1789_v17 = vadd.f32 %v1743_v57, %v1742_v53 }
 0x469   :  { %2261 = vpow2.f32 %v3194_v63  ;;  %v1773_v41 = vrot.slane %v1772_v54, 1  ;;  %v1779_v14 = vadd.f32 %v1778_v38, %v1777_v62  ;;  %v1784_v16 = vadd.f32 %v1783_v37, %v1782_v5 }
 0x46a   :  { %v2258_v49 = vpop.eup %2257  ;;  %v1148_v11 = vmul.f32 %v2254_v45, %v1140_v21  ;;  %v1149_v58 = vmul.f32 %v2256_v40, %v1141_v52  ;;  %v1744_v43 = vmul.f32 %v3147_v34, %v1140_v21  ;;  %v1745_v25 = vmul.f32 %v3142_v39, %v1141_v52  ;;  %v3251_v19 = vpop.permute.xlu1 %888 }
 0x46b   :  { %v1034_v36 = vmul.f32 %v3214_v7, %v3092_v60  ;;  %v1790_v55 = vrot.slane %v1789_v17, 4  ;;  %2263 = vpow2.f32 %v453_v12  ;;  %v1780_v63 = vrot.slane %v1779_v14, 1 }
 0x46c   :  { %v1153_v2 = vadd.f32 %v1148_v11, %v1029_v61  ;;  %v1796_v6 = vadd.f32 %v1745_v25, %v1744_v43  ;;  %v1785_v47 = vrot.slane %v1784_v16, 2  ;;  %v1033_v3 = vmul.f32 %v3214_v7, %v3005_v22 }
 0x46d   :  { %v2260_v9 = vpop.eup %2259  ;;  %v1791_v28 = vadd.f32 %v1790_v55, %v1789_v17  ;;  %v1774_v34 = vadd.f32 %v1773_v41, %v1772_v54  ;;  %v1781_v44 = vadd.f32 %v1780_v63, %v1779_v14  ;;  %v3700_v30 = vrot.slane %v2982_v50, 1  ;;  %v3704_v63 = vld [vmem:[#allocation9_spill] sm:$0xff] }
 0x46e   :  { %v1161_v39 = vmul.f32 %v2258_v49, %v1153_v2  ;;  %v1746_v18 = vmul.f32 %v3169_v15, %v1153_v2  ;;  %v1797_v61 = vrot.slane %v1796_v6, 4  ;;  %v1786_v8 = vadd.f32 %v1785_v47, %v1784_v16 }
 0x46f   :  { %1492 = vperm.xlu1 %2198, %v3698_v24   ;;  %v2262_v51 = vpop.eup %2261  ;;  %v1792_v56 = vrot.slane %v1791_v28, 2  ;;  %v1917_v20 = vadd.f32 %v3700_v30, %v1781_v44  ;;  %v1916_v38 = vadd.f32 %v2982_v50, %v1774_v34  ;;  %v3702_v24 = vld [vmem:[#allocation56_spill] sm:$0xff]  ;;  %v3703_v11 = vrot.slane %v2982_v50, 2 }
 0x470   :  { %1678 = vperm.xlu2 %2197, %v3696_v46   ;;  %v1154_v46 = vadd.f32 %v1149_v58, %v1030_v33  ;;  %v1166_v5 = vadd.f32 %v1161_v39, %v1031_v0  ;;  %v1798_v33 = vadd.f32 %v1797_v61, %v1796_v6  ;;  %v1787_v15 = vrot.slane %v1786_v8, 1 }
 0x471   :  { %v3243_v27 = vpop.permute.xlu2 %947  ;;  %v2264_v7 = vpop.eup %2263  ;;  %v1793_v54 = vadd.f32 %v1792_v56, %v1791_v28  ;;  %v1948_v62 = vrot.slane %v1917_v20, 7  ;;  %v1992_v2 = vmul.f32 0.5, %v3704_v63  ;;  %v1889_v44 = vrot.slane %v2982_v50, 4 }
 0x472   :  { %v1162_v48 = vmul.f32 %v2260_v9, %v1154_v46  ;;  %v1747_v60 = vmul.f32 %v3699_v32, %v1154_v46  ;;  %v1748_v13 = vmul.f32 %v3160_v59, %v1166_v5  ;;  %v1799_v40 = vrot.slane %v1798_v33, 2  ;;  %v3274_v47 = vpop.permute.xlu1 %901  ;;  %v3705_v9 = vld [vmem:[#allocation17_spill] sm:$0xff] }
 0x473   :  { %v1174_v37 = vmul.f32 %v2264_v7, %v1166_v5  ;;  %v1788_v12 = vadd.f32 %v1787_v15, %v1786_v8  ;;  %v1950_v43 = vsel %vm1949_vm3, %v1948_v62, %v1916_v38  ;;  %v3706_v39 = vrot.slane %v2982_v50, 3 }
 0x474   :  { %v1167_v45 = vadd.f32 %v1162_v48, %v1032_v29  ;;  %v1803_v22 = vadd.f32 %v1747_v60, %v1746_v18  ;;  %v1800_v14 = vadd.f32 %v1799_v40, %v1798_v33  ;;  %v3708_v33 = vld [vmem:[#allocation62_spill] sm:$0xff]  ;;  %v1891_v40 = vrot.slane %v2982_v50, 6 }
 0x475   :  { %v3267_v59 = vadd.f32 %v1174_v37, %v1033_v3  ;;  %v1918_v58 = vadd.f32 %v3703_v11, %v1788_v12  ;;  %v1999_v15 = vmul.f32 0.5, %v3708_v33 }
 0x476   :  { %v1175_v42 = vmul.f32 %v2262_v51, %v1167_v45  ;;  %v1749_v53 = vmul.f32 %v3188_v23, %v1167_v45  ;;  %v1804_v57 = vrot.slane %v1803_v22, 4  ;;  %v1794_v23 = vrot.slane %v1793_v54, 1  ;;  %v3707_v51 = vld [vmem:[#allocation10_spill] sm:$0xff] }
 0x477   :  { %2201 = vset.pattern.permute.xlu1 %v2564_v26  ;;  %v1801_v55 = vrot.slane %v1800_v14, 1  ;;  %v1951_v28 = vrot.slane %v1918_v58, 6  ;;  %v1994_v61 = vmul.f32 0.5, %v3707_v51  ;;  %v1890_v45 = vrot.slane %v2982_v50, 5 }
 0x478   :  { %2200 = vset.pattern.permute.xlu2 %v2582_v31  ;;  %v3260_v29 = vadd.f32 %v1175_v42, %v1034_v36  ;;  %v1805_v21 = vadd.f32 %v1804_v57, %v1803_v22  ;;  %v1810_v52 = vadd.f32 %v1749_v53, %v1748_v13  ;;  %v3701_v31 = vld [vmem:[#allocation45_spill] sm:$0xff]  ;;  %v1795_v36 = vadd.f32 %v1794_v23, %v1793_v54  ;;  %v3710_v23 = vld [vmem:[#allocation8_spill] sm:$0xff] }
 0x479   :  { %v1802_v34 = vadd.f32 %v1801_v55, %v1800_v14  ;;  %v1953_v60 = vsel %vm1952_vm4, %v1951_v28, %v1950_v43  ;;  %v3709_v57 = vld [vmem:[#allocation13_spill] sm:$0xff]  ;;  %v2003_v37 = vadd.f32 0.5, %v1999_v15  ;;  %v3719_v15 = vld [vmem:[#allocation63_spill] sm:$0xff] }
 0x47a   :  { %v316_v0 = vpop.permute.xlu2 %315  ;;  %v1806_v16 = vrot.slane %v1805_v21, 2  ;;  %v1811_v49 = vrot.slane %v1810_v52, 4  ;;  %v1919_v48 = vadd.f32 %v3706_v39, %v1795_v36  ;;  %v3287_v53 = vpop.permute.xlu1 %921  ;;  %v3714_v39 = vld [vmem:[#allocation21_spill] sm:$0xff] }
 0x47b   :  { %v320_v17 = vsel %vm157_vm14, %v3701_v31, %v316_v0  ;;  %v1920_v56 = vadd.f32 %v1889_v44, %v1802_v34  ;;  %v2007_v14 = vmul.f32 %v2003_v37, %v3710_v23  ;;  %v3712_v34 = vld [vmem:[#allocation59_spill] sm:$0xff]  ;;  %v3723_v37 = vld [vmem:[#allocation30_spill] sm:$0xff]  ;;  %v3724_v23 = vld [vmem:[#allocation37_spill] sm:$0xff] }
 0x47c   :  { %v3265_v41 = vadd.f32 %v3702_v24, %v320_v17  ;;  %v1807_v46 = vadd.f32 %v1806_v16, %v1805_v21  ;;  %v1812_v6 = vadd.f32 %v1811_v49, %v1810_v52  ;;  %v1954_v30 = vrot.slane %v1919_v48, 5 }
 0x47d   :  { %v1957_v7 = vrot.slane %v1920_v56, 4 }
 0x47e   :  { %v328_v25 = vand.u32 2147483647, %v3265_v41  ;;  %v1813_v18 = vrot.slane %v1812_v6, 2  ;;  %v1808_v32 = vrot.slane %v1807_v46, 1  ;;  %v1956_v22 = vsel %vm1955_vm5, %v1954_v30, %v1953_v60 }
 0x47f   :  { %1690 = vperm.xlu1 %2201, %v3705_v9   ;;  %v1959_v42 = vsel %vm1958_vm6, %v1957_v7, %v1956_v22  ;;  %v326_v55 = vmax.f32 %v3265_v41, 0.0  ;;  %v1892_v41 = vrot.slane %v2982_v50, 7  ;;  %v3717_v22 = vld [vmem:[#allocation60_spill] sm:$0xff] }
 0x480   :  { %v330_v3 = vsub.f32 0.0, %v328_v25  ;;  %1684 = vperm.xlu2 %2200, %v3705_v9   ;;  %v1814_v20 = vadd.f32 %v1813_v18, %v1812_v6  ;;  %v1809_v5 = vadd.f32 %v1808_v32, %v1807_v46  ;;  %v1625_v6 = vpop.permute.xlu0 %1624  ;;  %v3718_v7 = vld [vmem:[#allocation28_spill] sm:$0xff] }
 0x481   :  { %v3333_v33 = vsel %vm157_vm14, %v3718_v7, %v3717_v22 }
 0x482   :  { %v333_v8 = vmul.f32 1.442695, %v330_v3  ;;  %v1815_v54 = vrot.slane %v1814_v20, 1  ;;  %v1921_v62 = vadd.f32 %v1890_v45, %v1809_v5  ;;  %v935_v58 = vpop.permute.xlu1 %934  ;;  %v3711_v3 = vld [vmem:[#allocation11_spill] sm:$0xff]  ;;  %v1601_v5 = vpop.permute.xlu2 %1600 }
 0x483   :  { %v3308_v44 = vmul.f32 %v3712_v34, %v3711_v3  ;;  %v3729_v34 = vld [vmem:[#allocation41_spill] sm:$0xff] }
 0x484   :  { %2265 = vpow2.f32 %v333_v8  ;;  %v1816_v13 = vadd.f32 %v1815_v54, %v1814_v20  ;;  %v1960_v0 = vrot.slane %v1921_v62, 3  ;;  %v3720_v54 = vld [vmem:[#allocation39_spill] sm:$0xff] }
 0x485   :  { %2267 = vtanh.f32 %v1992_v2  ;;  %v3338_v62 = vsel %vm157_vm14, %v3720_v54, %v3719_v15 }
 0x486   :  { %2269 = vtanh.f32 %v1994_v61  ;;  %v1922_v12 = vadd.f32 %v1891_v40, %v1816_v13  ;;  %v1962_v38 = vsel %vm1961_vm7, %v1960_v0, %v1959_v42  ;;  %v3716_v61 = vld [vmem:[#allocation36_spill] sm:$0xff]  ;;  %v3722_v0 = vld [vmem:[#allocation53_spill] sm:$0xff] }
 0x487   :  { %1510 = vperm.xlu1 %2201, %v3709_v57   ;;  %v3323_v8 = vsel %vm157_vm14, %v3716_v61, %v1625_v6  ;;  %v3728_v6 = vld [vmem:[#allocation33_spill] sm:$0xff] }
 0x488   :  { %1504 = vperm.xlu2 %2200, %v3709_v57   ;;  %v1963_v17 = vrot.slane %v1922_v12, 2  ;;  %v3721_v57 = vld [vmem:[#allocation16_spill] sm:$0xff]  ;;  %v3346_v12 = vsel %vm157_vm14, %v3723_v37, %v3722_v0  ;;  %v3734_v0 = vld [vmem:[#allocation61_spill] sm:$0xff] }
 0x489   :  { %v971_v40 = vsel %vm157_vm14, %v3721_v57, %v3208_v35  ;;  %v973_v35 = vsel %vm157_vm14, %v3724_v23, %v3234_v4  ;;  %v3379_v4 = vsel %vm157_vm14, %v3728_v6, %v3224_v10 }
 0x48a   :  { %v2266_v21 = vpop.eup %2265  ;;  %v3295_v16 = vsel %vm1964_vm8, %v1963_v17, %v1962_v38  ;;  %v3328_v45 = vpop.permute.xlu1 %953 }
 0x48b   :  { %v2268_v52 = vpop.eup %2267  ;;  %v336_v31 = vadd.f32 1.0, %v2266_v21 }
 0x48c   :  { %v2270_v24 = vpop.eup %2269  ;;  %v2000_v49 = vmul.f32 0.5, %v2268_v52 }
 0x48d   :  { %2271 = vlog2.f32 %v336_v31  ;;  %v2002_v11 = vmul.f32 0.5, %v2270_v24 }
 0x48e   :  { %v2004_v43 = vadd.f32 0.5, %v2000_v49 }
 0x48f   :  { %2015 = vrot.lane.b32.xlu1 %v2007_v14, %s2336_s1  ;;  %v2006_v36 = vadd.f32 0.5, %v2002_v11 }
 0x490   :  { %2202 = vset.pattern.permute.xlu2 %v2564_v26  ;;  %v2008_v46 = vmul.f32 %v2004_v43, %v3704_v63  ;;  %v3713_v26 = vld [vmem:[#allocation52_spill] sm:$0xff]  ;;  %v3725_v43 = vld [vmem:[#allocation25_spill] sm:$0xff] }
 0x491   :  { %v3304_v28 = vmul.f32 %v2006_v36, %v3707_v51  ;;  %v3313_v48 = vsel %vm157_vm14, %v3714_v39, %v3713_v26  ;;  %v3715_v51 = vld [vmem:[#allocation31_spill] sm:$0xff] }
 0x492   :  { %v1631_v22 = vpop.permute.xlu2 %1630 }
 0x493   :  { %v2272_v25 = vpop.eup %2271 }
 0x494   :  { %v340_v2 = vmul.f32 0.6931472, %v2272_v25  ;;  %v3726_v25 = vld [vmem:[#allocation43_spill] sm:$0xff] }
 0x495   :  { %v3369_v36 = vsel %vm157_vm14, %v3726_v25, %v3725_v43 }
 0x496   :  { %v3301_v9 = vadd.f32 %v340_v2, %v326_v55  ;;  %v3727_v55 = vld [vmem:[#allocation18_spill] sm:$0xff] }
 0x497   :  { %v3374_v2 = vsel %vm157_vm14, %v3727_v55, %v3251_v19  ;;  %v3731_v19 = vld [vmem:[#allocation46_spill] sm:$0xff] }
 0x498   :  { %v354_v18 = vrot.slane %v3301_v9, 1  ;;  %v355_v63 = vrot.slane %v3301_v9, 2  ;;  %v356_v32 = vrot.slane %v3301_v9, 3  ;;  %v357_v60 = vrot.slane %v3301_v9, 4  ;;  %1702 = vperm.xlu2 %2202, %v3715_v51   ;;  %v3732_v51 = vld [vmem:[#allocation19_spill] sm:$0xff] }
 0x499   :  { %v358_v56 = vrot.slane %v3301_v9, 5  ;;  %v359_v30 = vrot.slane %v3301_v9, 6  ;;  %v369_v20 = vperm.slane %v3301_v9, 0  ;;  %v3364_v11 = vmul.f32 %v3301_v9, %v3711_v3  ;;  %v1607_v7 = vpop.permute.xlu1 %1606 }
 0x49a   :  { %v370_v42 = vperm.slane %v354_v18, 0  ;;  %v371_v13 = vperm.slane %v355_v63, 0  ;;  %v3348_v38 = vperm.slane %v356_v32, 0  ;;  %v3351_v52 = vperm.slane %v357_v60, 0  ;;  %v3730_v18 = vld [vmem:[#allocation35_spill] sm:$0xff] }
 0x49b   :  { %v409_v21 = vmul.f32 %v369_v20, %v3010_v1  ;;  %v3353_v31 = vperm.slane %v358_v56, 0  ;;  %v3355_v17 = vperm.slane %v359_v30, 0  ;;  %v3384_v3 = vsel %vm157_vm14, %v3729_v34, %v3274_v47 }
 0x49c   :  { %v411_v24 = vmul.f32 %v370_v42, %v3010_v1  ;;  %v413_v14 = vmul.f32 %v371_v13, %v3010_v1  ;;  %v415_v26 = vmul.f32 %v3348_v38, %v3010_v1  ;;  %v1718_v63 = vsel %vm157_vm14, %v3730_v18, %v1601_v5 }
 0x49d   :  { %v457_v49 = vmul.f32 1.442695, %v409_v21  ;;  %v3393_v32 = vsel %vm157_vm14, %v3731_v19, %v3243_v27  ;;  %v417_v10 = vmul.f32 %v3351_v52, %v3010_v1  ;;  %v419_v47 = vmul.f32 %v3353_v31, %v3010_v1  ;;  %v3733_v27 = vld [vmem:[#allocation44_spill] sm:$0xff] }
 0x49e   :  { %v461_v39 = vmul.f32 1.442695, %v411_v24  ;;  %v421_v60 = vmul.f32 %v3355_v17, %v3010_v1  ;;  %v981_v61 = vsel %vm157_vm14, %v3732_v51, %v3287_v53  ;;  %v465_v56 = vmul.f32 1.442695, %v413_v14 }
 0x49f   :  { %2273 = vpow2.f32 %v457_v49  ;;  %v532_v30 = vrot.slane %v3364_v11, 1  ;;  %v983_v5 = vsel %vm157_vm14, %v3733_v27, %v935_v58  ;;  %v533_v15 = vrot.slane %v3364_v11, 2  ;;  %v3735_v58 = vld [vmem:[#allocation48_spill] sm:$0xff] }
 0x4a0   :  { %2017 = vrot.lane.b32.xlu2 %v2008_v46, %s2336_s1  ;;  %v995_v54 = vperm.slane %v3364_v11, 0  ;;  %v1750_v57 = vmul.f32 %v1718_v63, %v3267_v59  ;;  %v410_v46 = vmul.f32 %v369_v20, %v3734_v0  ;;  %2275 = vpow2.f32 %v461_v39 }
 0x4a1   :  { %v469_v37 = vmul.f32 1.442695, %v415_v26  ;;  %v534_v53 = vrot.slane %v3364_v11, 3  ;;  %v535_v21 = vrot.slane %v3364_v11, 4  ;;  %v473_v24 = vmul.f32 1.442695, %v417_v10 }
 0x4a2   :  { %v477_v23 = vmul.f32 1.442695, %v419_v47  ;;  %v481_v14 = vmul.f32 1.442695, %v421_v60  ;;  %v3416_v49 = vsel %vm157_vm14, %v3735_v58, %v1631_v22  ;;  %2277 = vpow2.f32 %v465_v56 }
 0x4a3   :  { %v536_v25 = vrot.slane %v3364_v11, 5  ;;  %v537_v55 = vrot.slane %v3364_v11, 6  ;;  %v996_v20 = vperm.slane %v532_v30, 0  ;;  %v1035_v6 = vmul.f32 %v995_v54, %v971_v40 }
 0x4a4   :  { %v412_v26 = vmul.f32 %v370_v42, %v3734_v0  ;;  %v459_v39 = vmul.f32 1.442695, %v410_v46  ;;  %2279 = vpow2.f32 %v469_v37  ;;  %v997_v18 = vperm.slane %v533_v15, 0 }
 0x4a5   :  { %v2274_v43 = vpop.eup %2273  ;;  %v3422_v63 = vperm.slane %v534_v53, 0  ;;  %v3424_v19 = vperm.slane %v535_v21, 0  ;;  %v414_v60 = vmul.f32 %v371_v13, %v3734_v0  ;;  %v3427_v56 = vperm.slane %v536_v25, 0 }
 0x4a6   :  { %v1187_v34 = vmul.f32 %v2274_v43, %v3267_v59  ;;  %2281 = vpow2.f32 %v459_v39  ;;  %v463_v47 = vmul.f32 1.442695, %v412_v26  ;;  %v2276_v51 = vpop.eup %2275  ;;  %v3429_v40 = vperm.slane %v537_v55, 0  ;;  %v3736_v59 = vld [vmem:[#allocation26_spill] sm:$0xff]  ;;  %v1643_v55 = vpop.permute.xlu2 %1642  ;;  %v3738_v26 = vld [vmem:[#allocation29_spill] sm:$0xff] }
 0x4a7   :  { %2283 = vpow2.f32 %v473_v24  ;;  %v1719_v42 = vsel %vm157_vm14, %v3736_v59, %v1607_v7  ;;  %v1037_v27 = vmul.f32 %v996_v20, %v973_v35  ;;  %v1039_v37 = vmul.f32 %v997_v18, %v3338_v62 }
 0x4a8   :  { %v1192_v10 = vadd.f32 %v1187_v34, %v1035_v6  ;;  %2285 = vpow2.f32 %v477_v23  ;;  %v1751_v15 = vmul.f32 %v1719_v42, %v3260_v29  ;;  %v2278_v46 = vpop.eup %2277  ;;  %v1041_v13 = vmul.f32 %v3422_v63, %v3346_v12  ;;  %v3737_v23 = vld [vmem:[#allocation32_spill] sm:$0xff] }
 0x4a9   :  { %v1637_v30 = vpop.permute.xlu1 %1636  ;;  %2287 = vpow2.f32 %v481_v14  ;;  %v416_v53 = vmul.f32 %v3348_v38, %v3734_v0  ;;  %v467_v24 = vmul.f32 1.442695, %v414_v60  ;;  %v1043_v35 = vmul.f32 %v3424_v19, %v3737_v23 }
 0x4aa   :  { %v1200_v22 = vmul.f32 %v2276_v51, %v1192_v10  ;;  %2289 = vpow2.f32 %v463_v47  ;;  %v1817_v7 = vadd.f32 %v1751_v15, %v1750_v57  ;;  %v2280_v58 = vpop.eup %2279  ;;  %v3442_v43 = vmul.f32 %v3427_v56, %v981_v61 }
 0x4ab   :  { %v3445_v14 = vmul.f32 %v3429_v40, %v983_v5  ;;  %v538_v62 = vrot.slane %v3364_v11, 7  ;;  %v1036_v38 = vmul.f32 %v995_v54, %v3333_v33  ;;  %v418_v57 = vmul.f32 %v3351_v52, %v3734_v0  ;;  %v3739_v52 = vld [vmem:[#allocation49_spill] sm:$0xff]  ;;  %v3742_v11 = vld [vmem:[#allocation58_spill] sm:$0xff] }
 0x4ac   :  { %v1205_v21 = vadd.f32 %v1200_v22, %v1037_v27  ;;  %v2282_v12 = vpop.eup %2281  ;;  %v1818_v6 = vrot.slane %v1817_v7, 4  ;;  %v1038_v39 = vmul.f32 %v996_v20, %v3738_v26  ;;  %v471_v47 = vmul.f32 1.442695, %v416_v53 }
 0x4ad   :  { %v2284_v34 = vpop.eup %2283  ;;  %v1188_v61 = vmul.f32 %v2282_v12, %v3260_v29  ;;  %v360_v5 = vrot.slane %v3301_v9, 7  ;;  %2291 = vpow2.f32 %v467_v24  ;;  %v420_v33 = vmul.f32 %v3353_v31, %v3734_v0  ;;  %v3740_v9 = vld [vmem:[#allocation47_spill] sm:$0xff] }
 0x4ae   :  { %v1213_v25 = vmul.f32 %v2278_v46, %v1205_v21  ;;  %v2286_v60 = vpop.eup %2285  ;;  %v1819_v59 = vadd.f32 %v1818_v6, %v1817_v7  ;;  %v1040_v27 = vmul.f32 %v997_v18, %v3374_v2  ;;  %v1725_v22 = vsel %vm157_vm14, %v3739_v52, %v1643_v55 }
 0x4af   :  { %v2288_v54 = vpop.eup %2287  ;;  %v1193_v42 = vadd.f32 %v1188_v61, %v1036_v38  ;;  %v376_v15 = vperm.slane %v360_v5, 0  ;;  %v475_v24 = vmul.f32 1.442695, %v418_v57  ;;  %2293 = vpow2.f32 %v471_v47  ;;  %v3741_v61 = vld [vmem:[#allocation38_spill] sm:$0xff] }
 0x4b0   :  { %v1218_v51 = vadd.f32 %v1213_v25, %v1039_v37  ;;  %v2290_v29 = vpop.eup %2289  ;;  %v1820_v53 = vrot.slane %v1819_v59, 2  ;;  %v479_v18 = vmul.f32 1.442695, %v420_v33  ;;  %v1754_v55 = vmul.f32 %v3323_v8, %v1205_v21  ;;  %v1649_v33 = vpop.permute.xlu2 %1648 }
 0x4b1   :  { %v1613_v20 = vpop.permute.xlu1 %1612  ;;  %v1201_v7 = vmul.f32 %v2290_v29, %v1193_v42  ;;  %v1753_v23 = vmul.f32 %v3313_v48, %v1193_v42  ;;  %v423_v25 = vmul.f32 %v376_v15, %v3010_v1  ;;  %v1724_v48 = vsel %vm157_vm14, %v3741_v61, %v1637_v30 }
 0x4b2   :  { %v1226_v46 = vmul.f32 %v2280_v58, %v1218_v51  ;;  %v1720_v37 = vsel %vm157_vm14, %v3740_v9, %v1613_v20  ;;  %v1821_v2 = vadd.f32 %v1820_v53, %v1819_v59  ;;  %2295 = vpow2.f32 %v475_v24 }
 0x4b3   :  { %v1752_v31 = vmul.f32 %v1720_v37, %v1192_v10  ;;  %v1206_v38 = vadd.f32 %v1201_v7, %v1038_v39  ;;  %v2292_v6 = vpop.eup %2291  ;;  %v485_v10 = vmul.f32 1.442695, %v423_v25  ;;  %2297 = vpow2.f32 %v479_v18 }
 0x4b4   :  { %v3462_v12 = vadd.f32 %v1226_v46, %v1041_v13  ;;  %v1822_v57 = vrot.slane %v1821_v2, 1  ;;  %v422_v8 = vmul.f32 %v3355_v17, %v3734_v0  ;;  %v1756_v42 = vmul.f32 %v1724_v48, %v1218_v51 }
 0x4b5   :  { %v1824_v58 = vadd.f32 %v1753_v23, %v1752_v31  ;;  %v1755_v13 = vmul.f32 %v3416_v49, %v1206_v38  ;;  %v1214_v47 = vmul.f32 %v2292_v6, %v1206_v38  ;;  %v2294_v21 = vpop.eup %2293  ;;  %2299 = vpow2.f32 %v485_v10 }
 0x4b6   :  { %v1239_v26 = vmul.f32 %v2284_v34, %v3462_v12  ;;  %v1823_v1 = vadd.f32 %v1822_v57, %v1821_v2  ;;  %v483_v9 = vmul.f32 1.442695, %v422_v8  ;;  %v424_v51 = vmul.f32 %v376_v15, %v3734_v0 }
 0x4b7   :  { %v1825_v5 = vrot.slane %v1824_v58, 4  ;;  %v1831_v39 = vadd.f32 %v1755_v13, %v1754_v55  ;;  %v1219_v34 = vadd.f32 %v1214_v47, %v1040_v27  ;;  %v1893_v47 = vrot.slane %v3308_v44, 1 }
 0x4b8   :  { %v3470_v59 = vadd.f32 %v1239_v26, %v1043_v35  ;;  %v1923_v49 = vadd.f32 %v1892_v41, %v1823_v1  ;;  %v1042_v35 = vmul.f32 %v3422_v63, %v3384_v3  ;;  %v2296_v37 = vpop.eup %2295  ;;  %v1002_v63 = vperm.slane %v538_v62, 0  ;;  %v1661_v48 = vpop.permute.xlu2 %1660 }
 0x4b9   :  { %v1826_v52 = vadd.f32 %v1825_v5, %v1824_v58  ;;  %v1832_v20 = vrot.slane %v1831_v39, 4  ;;  %v1757_v29 = vmul.f32 %v1725_v22, %v1219_v34  ;;  %v1227_v53 = vmul.f32 %v2294_v21, %v1219_v34  ;;  %v2298_v7 = vpop.eup %2297  ;;  %v3743_v58 = vld [vmem:[#allocation40_spill] sm:$0xff] }
 0x4ba   :  { %v1252_v30 = vmul.f32 %v2286_v60, %v3470_v59  ;;  %v1966_v27 = vrot.slane %v1923_v49, 1  ;;  %v1726_v62 = vsel %vm157_vm14, %v3742_v11, %v1649_v33  ;;  %2301 = vpow2.f32 %v483_v9  ;;  %v3746_v9 = vld [vmem:[#allocation50_spill] sm:$0xff] }
 0x4bb   :  { %v1827_v46 = vrot.slane %v1826_v52, 2  ;;  %v1833_v60 = vadd.f32 %v1832_v20, %v1831_v39  ;;  %v1838_v24 = vadd.f32 %v1757_v29, %v1756_v42  ;;  %v1232_v41 = vadd.f32 %v1227_v53, %v1042_v35  ;;  %v2300_v2 = vpop.eup %2299 }
 0x4bc   :  { %v3480_v17 = vadd.f32 %v1252_v30, %v3442_v43  ;;  %v3488_v22 = vsel %vm1967_vm9, %v1966_v27, %v3295_v16  ;;  %v1044_v43 = vmul.f32 %v3424_v19, %v3369_v36  ;;  %v487_v16 = vmul.f32 1.442695, %v424_v51  ;;  %v3744_v30 = vld [vmem:[#allocation34_spill] sm:$0xff] }
 0x4bd   :  { %v1828_v50 = vadd.f32 %v1827_v46, %v1826_v52  ;;  %v1834_v23 = vrot.slane %v1833_v60, 2  ;;  %v1839_v0 = vrot.slane %v1838_v24, 4  ;;  %1985 = vrot.lane.b32.xlu1 %v3488_v22, %s2336_s1  ;;  %v1240_v31 = vmul.f32 %v2296_v37, %v1232_v41  ;;  %v3747_v37 = vld [vmem:[#allocation42_spill] sm:$0xff] }
 0x4be   :  { %v1265_v3 = vmul.f32 %v2288_v54, %v3480_v17  ;;  %v1758_v55 = vmul.f32 %v1726_v62, %v3462_v12  ;;  %v1049_v26 = vmul.f32 %v1002_v63, %v3393_v32  ;;  %v1046_v5 = vmul.f32 %v3427_v56, %v3379_v4  ;;  %v3745_v4 = vld [vmem:[#allocation20_spill] sm:$0xff] }
 0x4bf   :  { %v1829_v15 = vrot.slane %v1828_v50, 1  ;;  %v1835_v18 = vadd.f32 %v1834_v23, %v1833_v60  ;;  %v1840_v25 = vadd.f32 %v1839_v0, %v1838_v24  ;;  %v1245_v19 = vadd.f32 %v1240_v31, %v1044_v43 }
 0x4c0   :  { %v3495_v54 = vadd.f32 %v1265_v3, %v3445_v14  ;;  %2303 = vpow2.f32 %v487_v16  ;;  %v2302_v32 = vpop.eup %2301  ;;  %v1048_v49 = vmul.f32 %v3429_v40, %v3744_v30  ;;  %v986_v56 = vsel %vm157_vm14, %v3745_v4, %v3328_v45  ;;  %v2034_v4 = vld [vmem:[%s3606_s5 + $0x18] sm:$0xff] }
 0x4c1   :  { %v1830_v38 = vadd.f32 %v1829_v15, %v1828_v50  ;;  %v1655_v36 = vpop.permute.xlu1 %1654  ;;  %v1836_v57 = vrot.slane %v1835_v18, 1  ;;  %v1841_v61 = vrot.slane %v1840_v25, 2  ;;  %v1253_v1 = vmul.f32 %v2298_v7, %v1245_v19 }
 0x4c2   :  { %v1727_v6 = vsel %vm157_vm14, %v3743_v58, %v1655_v36  ;;  %v1278_v14 = vmul.f32 %v2300_v2, %v3495_v54  ;;  %v1894_v20 = vrot.slane %v3308_v44, 2  ;;  %v1728_v51 = vsel %vm157_vm14, %v3746_v9, %v1661_v48  ;;  %v2031_v9 = vld [vmem:[%s3606_s5] sm:$0xff] }
 0x4c3   :  { %v1924_v10 = vadd.f32 %v3308_v44, %v1830_v38  ;;  %v1759_v13 = vmul.f32 %v1727_v6, %v1232_v41  ;;  %v1837_v8 = vadd.f32 %v1836_v57, %v1835_v18  ;;  %v1842_v21 = vadd.f32 %v1841_v61, %v1840_v25  ;;  %v1487_v41 = vpop.permute.xlu2 %1486 }
 0x4c4   :  { %v3508_v12 = vadd.f32 %v1278_v14, %v1049_v26  ;;  %v1258_v34 = vadd.f32 %v1253_v1, %v1046_v5  ;;  %v1760_v50 = vmul.f32 %v1728_v51, %v3470_v59  ;;  %v1050_v3 = vmul.f32 %v1002_v63, %v986_v56  ;;  %v1481_v14 = vpop.permute.xlu0 %1480 }
 0x4c5   :  { %v1845_v39 = vadd.f32 %v1759_v13, %v1758_v55  ;;  %v1925_v33 = vadd.f32 %v1893_v47, %v1837_v8  ;;  %v1843_v42 = vrot.slane %v1842_v21, 1  ;;  %2021 = vrot.lane.b32.xlu1 %v3304_v28, %s2336_s1  ;;  %v1895_v18 = vrot.slane %v3308_v44, 3 }
 0x4c6   :  { %v1266_v35 = vmul.f32 %v2302_v32, %v1258_v34  ;;  %v2304_v40 = vpop.eup %2303  ;;  %v1896_v57 = vrot.slane %v3308_v44, 4  ;;  %v1897_v56 = vrot.slane %v3308_v44, 5 }
 0x4c7   :  { %v1846_v52 = vrot.slane %v1845_v39, 4  ;;  %v1844_v29 = vadd.f32 %v1843_v42, %v1842_v21  ;;  %v1969_v27 = vrot.slane %v1925_v33, 7  ;;  %v2038_v33 = vld [vmem:[%s3606_s5 + $0x38] sm:$0xff]  ;;  %v2037_v42 = vld [vmem:[%s3606_s5 + $0x30] sm:$0xff] }
 0x4c8   :  { %v3522_v60 = vadd.f32 %v1266_v35, %v1048_v49  ;;  %2059 = vmatpush.msra.mxu3 %v2038_v33  ;;  %v2035_v35 = vld [vmem:[%s3606_s5 + $0x20] sm:$0xff] }
 0x4c9   :  { %v1847_v46 = vadd.f32 %v1846_v52, %v1845_v39  ;;  %v1667_v53 = vpop.permute.xlu1 %1666  ;;  %v1926_v24 = vadd.f32 %v1894_v20, %v1844_v29  ;;  %v1970_v23 = vsel %vm1949_vm3, %v1969_v27, %v1924_v10  ;;  %v2032_v27 = vld [vmem:[%s3606_s5 + $0x8] sm:$0xff] }
 0x4ca   :  { %v1729_v28 = vsel %vm157_vm14, %v3747_v37, %v1667_v53  ;;  %v1279_v43 = vmul.f32 %v2304_v40, %v3522_v60  ;;  %2060 = vmatpush.msra.mxu3 %v2037_v42  ;;  %v2305_v42 = vld [vmem:[%s3601_s0] sm:$0xff] }
 0x4cb   :  { %v1848_v45 = vrot.slane %v1847_v46, 2  ;;  %v1761_v7 = vmul.f32 %v1729_v28, %v1245_v19  ;;  %v1971_v0 = vrot.slane %v1926_v24, 6  ;;  %v1679_v19 = vpop.permute.xlu2 %1678 }
 0x4cc   :  { %v3527_v2 = vadd.f32 %v1279_v43, %v1050_v3  ;;  %v1731_v26 = vsel %vm157_vm14, %v1487_v41, %v1679_v19  ;;  %v1697_v43 = vpop.permute.xlu0 %1696 }
 0x4cd   :  { %v1849_v15 = vadd.f32 %v1848_v45, %v1847_v46  ;;  %v1852_v31 = vadd.f32 %v1761_v7, %v1760_v50  ;;  %v1972_v16 = vsel %vm1952_vm4, %v1971_v0, %v1970_v23  ;;  %v1763_v13 = vmul.f32 %v1731_v26, %v1258_v34  ;;  %v2033_v46 = vld [vmem:[%s3606_s5 + $0x10] sm:$0xff]  ;;  %v3748_v50 = vld [vmem:[#allocation55_spill] sm:$0xff] }
 0x4cf   :  { %v1850_v11 = vrot.slane %v1849_v15, 1  ;;  %v1853_v62 = vrot.slane %v1852_v31, 4 }
 0x4d1   :  { %v1851_v59 = vadd.f32 %v1850_v11, %v1849_v15  ;;  %v1854_v25 = vadd.f32 %v1853_v62, %v1852_v31 }
 0x4d3   :  { %v1927_v38 = vadd.f32 %v1895_v18, %v1851_v59  ;;  %v1855_v36 = vrot.slane %v1854_v25, 2 }
 0x4d5   :  { %v1973_v63 = vrot.slane %v1927_v38, 5  ;;  %v1856_v55 = vadd.f32 %v1855_v36, %v1854_v25 }
 0x4d7   :  { %v1857_v58 = vrot.slane %v1856_v55, 1  ;;  %v1974_v6 = vsel %vm1955_vm5, %v1973_v63, %v1972_v16 }
 0x4d9   :  { %v1858_v61 = vadd.f32 %v1857_v58, %v1856_v55  ;;  %v1673_v48 = vpop.permute.xlu1 %1672  ;;  %v1898_v55 = vrot.slane %v3308_v44, 6 }
 0x4da   :  { %v1730_v10 = vsel %vm157_vm14, %v1481_v14, %v1673_v48  ;;  %v1685_v30 = vpop.permute.xlu2 %1684  ;;  %v1899_v48 = vrot.slane %v3308_v44, 7 }
 0x4db   :  { %v1928_v47 = vadd.f32 %v1896_v57, %v1858_v61  ;;  %v1762_v5 = vmul.f32 %v1730_v10, %v3480_v17  ;;  %v2036_v17 = vld [vmem:[%s3606_s5 + $0x28] sm:$0xff] }
 0x4dc   :  { %2061 = vmatpush.msra.mxu3 %v2036_v17 }
 0x4dd   :  { %v1975_v1 = vrot.slane %v1928_v47, 4  ;;  %v1859_v8 = vadd.f32 %v1763_v13, %v1762_v5 }
 0x4de   :  { %2062 = vmatpush.msra.mxu3 %v2035_v35  ;;  %v2307_v35 = vld [vmem:[%s3601_s0 + $0x10] sm:$0xff] }
 0x4df   :  { %v1860_v21 = vrot.slane %v1859_v8, 4  ;;  %v1976_v39 = vsel %vm1958_vm6, %v1975_v1, %v1974_v6  ;;  %v2020_v1 = vpop.permute.xlu0 %2019 }
 0x4e0   :  { %2063 = vmatpush.msra.mxu3 %v2034_v4 }
 0x4e1   :  { %v1861_v32 = vadd.f32 %v1860_v21, %v1859_v8  ;;  %v1493_v29 = vpop.permute.xlu1 %1492 }
 0x4e2   :  { %2064 = vmatpush.msra.mxu3 %v2033_v46  ;;  %v1732_v28 = vsel %vm157_vm14, %v1493_v29, %v1685_v30  ;;  %v1505_v40 = vpop.permute.xlu2 %1504 }
 0x4e3   :  { %v1862_v52 = vrot.slane %v1861_v32, 2  ;;  %v1764_v45 = vmul.f32 %v1732_v28, %v3495_v54  ;;  %v1734_v0 = vsel %vm157_vm14, %v1505_v40, %v1697_v43 }
 0x4e4   :  { %2065 = vmatpush.msra.mxu3 %v2032_v27  ;;  %v1766_v16 = vmul.f32 %v1734_v0, %v3508_v12 }
 0x4e5   :  { %v1863_v34 = vadd.f32 %v1862_v52, %v1861_v32 }
 0x4e6   :  { %2066 = vmatpush.msra.mxu3 %v2031_v9 }
 0x4e7   :  { %v1864_v49 = vrot.slane %v1863_v34, 1 }
 0x4e9   :  { %v1865_v20 = vadd.f32 %v1864_v49, %v1863_v34  ;;  %v2306_v34 = vld [vmem:[%s3601_s0 + $0x8] sm:$0xff] }
 0x4eb   :  { %v1929_v53 = vadd.f32 %v1897_v56, %v1865_v20  ;;  %v2308_v20 = vld [vmem:[%s3601_s0 + $0x18] sm:$0xff] }
 0x4ed   :  { %v1977_v51 = vrot.slane %v1929_v53, 3 }
 0x4ef   :  { %v1978_v37 = vsel %vm1961_vm7, %v1977_v51, %v1976_v39 }
 0x4f1   :  { %v1691_v24 = vpop.permute.xlu1 %1690 }
 0x4f2   :  { %v1733_v41 = vsel %vm157_vm14, %v3748_v50, %v1691_v24  ;;  %v1703_v15 = vpop.permute.xlu2 %1702 }
 0x4f3   :  { %v1765_v7 = vmul.f32 %v1733_v41, %v3522_v60 }
 0x4f5   :  { %v1866_v3 = vadd.f32 %v1765_v7, %v1764_v45 }
 0x4f7   :  { %v1867_v23 = vrot.slane %v1866_v3, 4 }
 0x4f9   :  { %v1868_v31 = vadd.f32 %v1867_v23, %v1866_v3  ;;  %v1511_v11 = vpop.permute.xlu1 %1510 }
 0x4fa   :  { %v1735_v62 = vsel %vm157_vm14, %v1511_v11, %v1703_v15  ;;  %v2018_v47 = vpop.permute.xlu2 %2017 }
 0x4fb   :  { %v1869_v18 = vrot.slane %v1868_v31, 2  ;;  %v1767_v59 = vmul.f32 %v1735_v62, %v3527_v2 }
 0x4fd   :  { %v1870_v25 = vadd.f32 %v1869_v18, %v1868_v31  ;;  %v1873_v38 = vadd.f32 %v1767_v59, %v1766_v16 }
 0x4ff   :  { %v1871_v54 = vrot.slane %v1870_v25, 1  ;;  %v1874_v36 = vrot.slane %v1873_v38, 4 }
 0x501   :  { %v1872_v60 = vadd.f32 %v1871_v54, %v1870_v25  ;;  %v1875_v63 = vadd.f32 %v1874_v36, %v1873_v38  ;;  %v2016_v19 = vpop.permute.xlu1 %2015 }
 0x502   :  { %v2027_v58 = vmul.f32 %v2016_v19, %v3488_v22 }
 0x503   :  { %v1876_v6 = vrot.slane %v1875_v63, 2  ;;  %v1930_v26 = vadd.f32 %v1898_v55, %v1872_v60 }
 0x504   :  { %2118 = vmatmul.msk.f32.vlgmr.msra.gmra.mxu3 %vm157_vm14, %v2027_v58 }
 0x505   :  { %v1877_v14 = vadd.f32 %v1876_v6, %v1875_v63  ;;  %v1979_v12 = vrot.slane %v1930_v26, 2 }
 0x507   :  { %v1878_v57 = vrot.slane %v1877_v14, 1  ;;  %v1980_v2 = vsel %vm1964_vm8, %v1979_v12, %v1978_v37 }
 0x509   :  { %v1879_v61 = vadd.f32 %v1878_v57, %v1877_v14 }
 0x50b   :  { %v1931_v10 = vadd.f32 %v1899_v48, %v1879_v61 }
 0x50d   :  { %v1981_v13 = vrot.slane %v1931_v10, 1 }
 0x50f   :  { %v1982_v5 = vsel %vm1967_vm9, %v1981_v13, %v1980_v2 }
 0x510   :  { %1987 = vrot.lane.b32.xlu2 %v1982_v5, %s2336_s1  ;;  %v2028_v22 = vmul.f32 %v2018_v47, %v1982_v5 }
 0x512   :  { %2119 = vmatmul.msk.f32.gmra.mxu3 %vm157_vm14, %v2028_v22 }
 0x52f   :  { %v1986_v8 = vpop.permute.xlu1 %1985 }
 0x530   :  { %v2029_v21 = vmul.f32 %v2020_v1, %v1986_v8 }
 0x532   :  { %2120 = vmatmul.msk.f32.gmra.mxu3 %vm157_vm14, %v2029_v21 }
 0x537   :  { %v2022_v39 = vpop.permute.xlu1 %2021 }
 0x56a   :  { %v1988_v32 = vpop.permute.xlu2 %1987 }
 0x56b   :  { %v2030_v33 = vmul.f32 %v2022_v39, %v1988_v32 }
 0x56d   :  { %2121 = vmatmul.msk.f32.gmra.mxu3 %vm157_vm14, %v2030_v33 }
 0x587   :  { %v2068_v44 = vpop.f32.mrf.mxu3 }
 0x588   :  { %v2080_v52 = vadd.f32 %v2305_v42, %v2068_v44 }
 0x58a   :  { %2084 = vst.msk [vmem:[#allocation5] sm:$0xff] %vm32_vm0, %v2080_v52 }
 0x595   :  { %v2071_v17 = vpop.f32.mrf.mxu3 }
 0x596   :  { %v2081_v30 = vadd.f32 %v2306_v34, %v2071_v17 }
 0x598   :  { %2085 = vst.msk [vmem:[#allocation5 + $0x8] sm:$0xff] %vm32_vm0, %v2081_v30 }
 0x5b5   :  { %v2074_v49 = vpop.f32.mrf.mxu3 }
 0x5b6   :  { %v2082_v4 = vadd.f32 %v2307_v35, %v2074_v49 }
 0x5b8   :  { %2086 = vst.msk [vmem:[#allocation5 + $0x10] sm:$0xff] %vm32_vm0, %v2082_v4 }
 0x5f0   :  { %v2077_v56 = vpop.f32.mrf.mxu3 }
 0x5f1   :  { %v2083_v29 = vadd.f32 %v2308_v20, %v2077_v56 }
 0x5f3   :  { %2087 = vst.msk [vmem:[#allocation5 + $0x18] sm:$0xff] %vm32_vm0, %v2083_v29 }
 0x5f4   :  { %2100 = dma.vmem_to_hbm [thread:$0]  %s2093_s7, 512, %s2095_s10, [#allocation6], %s2338_s2, %s2338_s2, %s2339_s13  }
 0x5f5   :  { %2333 = dma.done.wait [#allocation6], 512  }
 0x5f6   :  { %2334 = vsyncadd [#allocation6], 4294966784 }
 0x5f7   :  { %2105 = vsyncpa [#allocation6], 1 }

</bundles_post_ra>
